<compile_context>
chip_gen: v7x
topology: tpu7x:2x2x1
jax: 0.10.0
libtpu: 0.0.40
codegen_flags: <defaults>
</compile_context>

<pallas_src>
import functools

import jax
import jax.numpy as jnp
from jax.experimental import pallas as pl
from jax.experimental.pallas import tpu as pltpu


def _transe_kernel(x_ref, emb_e_ref, emb_r_ref, out_ref, *, distance):
    # x_ref:     (BM, 3)      int32  triples for this grid block
    # emb_e_ref: (n_e, k_pad) f32    full entity table (VMEM resident)
    # emb_r_ref: (n_r, k_pad) f32    full relation table (VMEM resident)
    # out_ref:   (1, BM)      f32    lane-dense energies for this block
    x = x_ref[...]
    hs = x[:, 0:1]  # (BM, 1)
    ls = x[:, 1:2]
    ts = x[:, 2:3]

    emb_e = emb_e_ref[...]  # (n_e, k_pad)
    emb_r = emb_r_ref[...]  # (n_r, k_pad)
    bm = x.shape[0]
    n_e = emb_e.shape[0]
    n_r = emb_r.shape[0]

    iota_e = jax.lax.broadcasted_iota(jnp.int32, (bm, n_e), 1)
    iota_r = jax.lax.broadcasted_iota(jnp.int32, (bm, n_r), 1)

    # Fused head/tail gather: signed one-hot (values in {-1, 0, +1}) gives
    # E[h] - E[t] with a single entity-table matmul.  Note: out-of-range
    # indices silently produce a zero row (nn.Embedding would raise instead).
    oh_d = ((iota_e == hs).astype(jnp.float32)
            - (iota_e == ts).astype(jnp.float32))          # (BM, n_e)
    oh_l = (iota_r == ls).astype(jnp.float32)               # (BM, n_r)

    d = (jnp.dot(oh_d, emb_e, preferred_element_type=jnp.float32)
         + jnp.dot(oh_l, emb_r, preferred_element_type=jnp.float32))  # (BM, k_pad)

    if distance == "l1":
        red = jnp.sum(jnp.abs(d), axis=1, keepdims=True)     # (BM, 1)
        f_row = red.reshape(1, bm)                           # lane-dense row
    else:  # 'l2'  (forward only; sqrt grad at 0 would need eps / custom VJP)
        red = jnp.sum(d * d, axis=1, keepdims=True)          # (BM, 1)
        f_row = jnp.sqrt(red.reshape(1, bm))                 # sqrt on dense row
    out_ref[...] = f_row.astype(out_ref.dtype)


def transe_forward(x, emb_e, emb_r, *, distance="l2", block_m=256):
    """TransE energy f(h, l, t) = ||E[h] + R[l] - E[t]|| -> shape (M, 1)."""
    m = x.shape[0]
    n_e, k = emb_e.shape
    n_r, k_r = emb_r.shape
    assert k == k_r

    # Zero-pad the embedding dim to a multiple of 128 lanes (energy unchanged).
    k_pad = ((k + 127) // 128) * 128
    if k_pad != k:
        emb_e = jnp.pad(emb_e, ((0, 0), (0, k_pad - k)))
        emb_r = jnp.pad(emb_r, ((0, 0), (0, k_pad - k)))

    # Pad M up to a multiple of block_m; padded rows use (valid) index 0 and
    # are sliced away after the kernel.
    num_blocks = pl.cdiv(m, block_m)
    m_pad = num_blocks * block_m
    if m_pad != m:
        x = jnp.pad(x, ((0, m_pad - m), (0, 0)))

    kernel = functools.partial(_transe_kernel, distance=distance)

    # Explicit VMEM budget: single-buffered tables + per-block temporaries,
    # with headroom; keeps the same config working on v5e/v6e/v7x.
    table_bytes = 4 * (n_e + n_r) * k_pad
    block_bytes = 4 * block_m * (4 * n_e + 2 * n_r + 2 * k_pad + 2 * 128)
    vmem_limit = int(min(max(2 * (table_bytes + block_bytes), 32 << 20),
                         64 << 20))

    out = pl.pallas_call(
        kernel,
        out_shape=jax.ShapeDtypeStruct((1, m_pad), jnp.float32),
        grid_spec=pltpu.PrefetchScalarGridSpec(
            num_scalar_prefetch=0,
            grid=(num_blocks,),
            in_specs=[
                # Triples: one (block_m, 3) block of rows per grid step.
                pl.BlockSpec((block_m, 3), lambda i: (i, 0)),
                # Full embedding tables, grid-invariant -> single-buffered.
                pl.BlockSpec((n_e, k_pad), lambda i: (0, 0),
                             pipeline_mode=pl.Buffered(1)),
                pl.BlockSpec((n_r, k_pad), lambda i: (0, 0),
                             pipeline_mode=pl.Buffered(1)),
            ],
            # Lane-dense output: each grid step writes a (1, block_m) row slab.
            out_specs=pl.BlockSpec((1, block_m), lambda i: (0, i)),
        ),
        compiler_params=pltpu.CompilerParams(
            dimension_semantics=("parallel",),
            vmem_limit_bytes=vmem_limit,
        ),
    )(x, emb_e, emb_r)

    return out[0, :m].reshape(m, 1)


if __name__ == "__main__":
    # Small synthetic shapes consistent with the module's __init__:
    #   n_e entities, n_r relations, embedding size k, triples X of shape (M, 3).
    n_e, n_r, k = 64, 16, 50
    m = 300  # deliberately NOT a multiple of block_m -> exercises tail padding

    key = jax.random.PRNGKey(0)
    k_e, k_r, k_h, k_l, k_t = jax.random.split(key, 5)

    # Deterministic uniform(-r, r) init, r = 6 / sqrt(k), as in the module.
    r = 6.0 / jnp.sqrt(jnp.float32(k))
    emb_e = jax.random.uniform(k_e, (n_e, k), jnp.float32, minval=-r, maxval=r)
    emb_r = jax.random.uniform(k_r, (n_r, k), jnp.float32, minval=-r, maxval=r)

    hs = jax.random.randint(k_h, (m,), 0, n_e, dtype=jnp.int32)
    ls = jax.random.randint(k_l, (m,), 0, n_r, dtype=jnp.int32)
    ts = jax.random.randint(k_t, (m,), 0, n_e, dtype=jnp.int32)
    x = jnp.stack([hs, ls, ts], axis=1)  # (M, 3) int32 triples

    # L2 branch (module default).
    out = transe_forward(x, emb_e, emb_r, distance="l2", block_m=256)
    out = jax.block_until_ready(out)
    ref = jnp.sqrt(
        jnp.sum((emb_e[hs] + emb_r[ls] - emb_e[ts]) ** 2, axis=1, keepdims=True)
    )
    assert out.shape == (m, 1)
    assert jnp.allclose(out, ref, atol=1e-5, rtol=1e-5)

    # L1 branch.
    out_l1 = transe_forward(x, emb_e, emb_r, distance="l1", block_m=256)
    out_l1 = jax.block_until_ready(out_l1)
    ref_l1 = jnp.sum(
        jnp.abs(emb_e[hs] + emb_r[ls] - emb_e[ts]), axis=1, keepdims=True
    )
    assert jnp.allclose(out_l1, ref_l1, atol=1e-5, rtol=1e-5)

    print("KERNEL_OK")
</pallas_src>

<mosaic_0001>
module attributes {stable_mosaic.version = 11 : i64} {
  func.func @_transe_kernel(%arg0: i32, %arg1: memref<256x3xi32, #tpu.memory_space<vmem>>, %arg2: memref<64x128xf32, #tpu.memory_space<vmem>>, %arg3: memref<16x128xf32, #tpu.memory_space<vmem>>, %arg4: memref<1x256xf32, #tpu.memory_space<vmem>>) attributes {dimension_semantics = [#tpu.dimension_semantics<parallel>], iteration_bounds = array<i64: 2>, scalar_prefetch = 0 : i64, scratch_operands = 0 : i64, tpu.core_type = #tpu.core_type<tc>, window_params = [{transform_indices = @transform_0, window_bounds = array<i64: 256, 3>}, {pipeline_mode = #tpu.pipeline_mode<synchronous>, transform_indices = @transform_1, window_bounds = array<i64: 64, 128>}, {pipeline_mode = #tpu.pipeline_mode<synchronous>, transform_indices = @transform_2, window_bounds = array<i64: 16, 128>}, {transform_indices = @transform_3, window_bounds = array<i64: 1, 256>}]} {
    %c0 = arith.constant 0 : index
    %c0_0 = arith.constant 0 : index
    %0 = vector.load %arg1[%c0, %c0_0] : memref<256x3xi32, #tpu.memory_space<vmem>>, vector<256x3xi32>
    %1 = vector.extract_strided_slice %0 {offsets = [0, 0], sizes = [256, 1], strides = [1, 1]} : vector<256x3xi32> to vector<256x1xi32>
    %2 = vector.extract_strided_slice %0 {offsets = [0, 1], sizes = [256, 1], strides = [1, 1]} : vector<256x3xi32> to vector<256x1xi32>
    %3 = vector.extract_strided_slice %0 {offsets = [0, 2], sizes = [256, 1], strides = [1, 1]} : vector<256x3xi32> to vector<256x1xi32>
    %c0_1 = arith.constant 0 : index
    %c0_2 = arith.constant 0 : index
    %4 = vector.load %arg2[%c0_1, %c0_2] : memref<64x128xf32, #tpu.memory_space<vmem>>, vector<64x128xf32>
    %c0_3 = arith.constant 0 : index
    %c0_4 = arith.constant 0 : index
    %5 = vector.load %arg3[%c0_3, %c0_4] : memref<16x128xf32, #tpu.memory_space<vmem>>, vector<16x128xf32>
    %6 = tpu.iota {dimensions = array<i32: 1>} : vector<256x64xi32>
    %7 = tpu.iota {dimensions = array<i32: 1>} : vector<256x16xi32>
    %8 = vector.broadcast %1 : vector<256x1xi32> to vector<256x64xi32>
    %9 = arith.cmpi eq, %6, %8 : vector<256x64xi32>
    %10 = arith.extui %9 : vector<256x64xi1> to vector<256x64xi32>
    %11 = arith.sitofp %10 : vector<256x64xi32> to vector<256x64xf32>
    %12 = vector.broadcast %3 : vector<256x1xi32> to vector<256x64xi32>
    %13 = arith.cmpi eq, %6, %12 : vector<256x64xi32>
    %14 = arith.extui %13 : vector<256x64xi1> to vector<256x64xi32>
    %15 = arith.sitofp %14 : vector<256x64xi32> to vector<256x64xf32>
    %16 = arith.subf %11, %15 : vector<256x64xf32>
    %17 = vector.broadcast %2 : vector<256x1xi32> to vector<256x16xi32>
    %18 = arith.cmpi eq, %7, %17 : vector<256x16xi32>
    %19 = arith.extui %18 : vector<256x16xi1> to vector<256x16xi32>
    %20 = arith.sitofp %19 : vector<256x16xi32> to vector<256x16xf32>
    %cst = arith.constant dense<0.000000e+00> : vector<256x128xf32>
    %21 = tpu.matmul %16, %4, %cst {dimension_numbers = #tpu.dot_dimension_numbers<[1], [0], [0], [1], [0, 0, 1, 1], [], []>} : vector<256x64xf32>, vector<64x128xf32>, vector<256x128xf32> -> vector<256x128xf32>
    %cst_5 = arith.constant dense<0.000000e+00> : vector<256x128xf32>
    %22 = tpu.matmul %20, %5, %cst_5 {dimension_numbers = #tpu.dot_dimension_numbers<[1], [0], [0], [1], [0, 0, 1, 1], [], []>} : vector<256x16xf32>, vector<16x128xf32>, vector<256x128xf32> -> vector<256x128xf32>
    %23 = arith.addf %21, %22 : vector<256x128xf32>
    %24 = arith.mulf %23, %23 : vector<256x128xf32>
    %cst_6 = arith.constant dense<0.000000e+00> : vector<256xf32>
    %25 = vector.multi_reduction <add>, %24, %cst_6 [1] : vector<256x128xf32> to vector<256xf32>
    %26 = vector.shape_cast %25 : vector<256xf32> to vector<256x1xf32>
    %27 = vector.shape_cast %26 : vector<256x1xf32> to vector<1x256xf32>
    %28 = math.sqrt %27 : vector<1x256xf32>
    %c0_7 = arith.constant 0 : index
    %c0_8 = arith.constant 0 : index
    %29 = vector.load %arg4[%c0_7, %c0_8] : memref<1x256xf32, #tpu.memory_space<vmem>>, vector<1x256xf32>
    tpu.vector_store %arg4[%c0_7, %c0_8], %28 {strides = array<i32>} : memref<1x256xf32, #tpu.memory_space<vmem>>, vector<1x256xf32>,
    return
  }
  func.func @transform_0(%arg0: i32) -> (i32, i32) {
    %c0_i32 = arith.constant 0 : i32
    %c0_i32_0 = arith.constant 0 : i32
    return %arg0, %c0_i32 : i32, i32
  }
  func.func @transform_1(%arg0: i32) -> (i32, i32) {
    %c0_i32 = arith.constant 0 : i32
    %c0_i32_0 = arith.constant 0 : i32
    %c0_i32_1 = arith.constant 0 : i32
    return %c0_i32, %c0_i32_0 : i32, i32
  }
  func.func @transform_2(%arg0: i32) -> (i32, i32) {
    %c0_i32 = arith.constant 0 : i32
    %c0_i32_0 = arith.constant 0 : i32
    %c0_i32_1 = arith.constant 0 : i32
    return %c0_i32, %c0_i32_0 : i32, i32
  }
  func.func @transform_3(%arg0: i32) -> (i32, i32) {
    %c0_i32 = arith.constant 0 : i32
    %c0_i32_0 = arith.constant 0 : i32
    return %c0_i32, %arg0 : i32, i32
  }
}

</mosaic_0001>

<bundles_post_ra>
// kernel: tpu_custom_call.1
= control target key start
LH: loop header
LB: loop body
LE: loop exit
PB: predicated region body
PF: predicated region fallthrough
CT: control target
= control target key end

     0   :  { %8 = vsyncpa [#allocation3], 0  ;;  %s7198_s0 = inlined_call_operand.vmem [shape: s32[512,3], index: 0, kind: input, shape index: {}]   ;;  %s7199_s1 = inlined_call_operand.vmem [shape: f32[64,128], index: 1, kind: input, shape index: {}]   ;;  %s7200_s2 = inlined_call_operand.vmem [shape: f32[16,128], index: 2, kind: input, shape index: {}]   ;;  %s7201_s3 = inlined_call_operand.hbm [shape: f32[1,512], index: 3, kind: output, shape index: {}]  }
   0x1   :  { %10 = vsyncpa [#allocation3 + $0x1], 0  ;;  %s5433_s12 = smov 0   ;;  %s5435_s13 = smov 0  }
   0x2   :  { %s5437_s14 = smov 0   ;;  %s5439_s15 = smov 0  }
   0x3 LB: > { %s4790_s16 = sadd.s32 4294967295, %s5405_s15   ;;  %s4791_s17 = sadd.s32 4294967294, %s5405_s15   ;;  %s5405_s15 = sphi %s5439_s15, %s7207_s15   ;;  %s5401_s14 = sphi %s5437_s14, %s7206_s14   ;;  %s5397_s13 = sphi %s5435_s13, %s7205_s13   ;;  %s5393_s12 = sphi %s5433_s12, %s7204_s12  }
   0x4   : > { %s5456_s18 = sadd.s32 1, %s5405_s15   ;;  %s91_s19 = sadd.s32 1, %s5401_s14 }
   0x5   : > { %s88_s20 = ssub.s32 %s5405_s15, %s5456_s18  ;;  %p101_p0 = scmp.ne.s32.totalorder %s5401_s14, %s5397_s13 }
   0x6   : > { %p89_p1 = scmp.eq.s32.totalorder %s88_s20, 0  ;;  %p102_p2 = scmp.eq.s32.totalorder %s4790_s16, 1 }
   0x7   : > { %p107_p3 = scmp.ne.s32.totalorder %s5397_s13, %s5393_s12  ;;  %p108_p4 = scmp.eq.s32.totalorder %s4791_s17, 1 }
   0x8   : > { %s5466_s21 = scalar_select %p89_p1, %s5401_s14, %s91_s19  }
   0x9   : > { %p5468_p5 = por %p102_p2, %p101_p0  ;;  %p5472_p6 = por %p108_p4, %p107_p3 }
   0xa   : > { %p4794_p7 = scmp.ge.s32.totalorder %s5405_s15, 1  ;;  %p141_p8 = scmp.lt.s32.totalorder %s5405_s15, 3 }
   0xc   : > { %p142_p9 = pnand %p4794_p7, %p141_p8 }
   0xd   : > { %s5478_s24 = sshll.u32 (!%p142_p9), %s4790_s16, 5  ;;  %v5407_v0 = vmov (!%p142_p9), 0   ;;  %v5408_v20 = vmov (!%p142_p9), 1   ;;  %v212_v23 = vld [vmem:[%s7200_s2] sm:$0xff] (!%p142_p9)  ;;  %v213_v24 = vld [vmem:[%s7200_s2 + $0x8] sm:$0xff] (!%p142_p9)  ;;  %v206_v29 = vld [vmem:[%s7199_s1 + $0x10] sm:$0xff] (!%p142_p9) }
   0xe   : > { %145 = sbr.rel (%p142_p9) target bundleno = 970 (0x3ca), region = 32  ;;  %5259 = vset.pattern.permute.xlu1 (!%p142_p9), %v5407_v0  ;;  %5258 = vset.pattern.permute.xlu0 (!%p142_p9), %v5407_v0  ;;  %p166_p10 = scmp.lt.s32.totalorder (!%p142_p9), %s5478_s24, 63  ;;  %v5154_v25 = vpack.c.bf16 (!%p142_p9), %v213_v24, %v212_v23  ;;  %v204_v26 = vld [vmem:[%s7199_s1] sm:$0xff] (!%p142_p9)  ;;  %v205_v27 = vld [vmem:[%s7199_s1 + $0x8] sm:$0xff] (!%p142_p9)  ;;  %v207_v30 = vld [vmem:[%s7199_s1 + $0x18] sm:$0xff] (!%p142_p9)  ;;  %v5409_v35 = vmov (!%p142_p9), 2  }
   0xf   : > { %v5590_v28 = vpack.c.bf16 (!%p142_p9), %v205_v27, %v204_v26  ;;  %v5603_v31 = vpack.c.bf16 (!%p142_p9), %v207_v30, %v206_v29  ;;  %v208_v32 = vld [vmem:[%s7199_s1 + $0x20] sm:$0xff] (!%p142_p9)  ;;  %v209_v33 = vld [vmem:[%s7199_s1 + $0x28] sm:$0xff] (!%p142_p9)  ;;  %v210_v36 = vld [vmem:[%s7199_s1 + $0x30] sm:$0xff] (!%p142_p9)  ;;  %vm824_vm0 = vcmask (!%p142_p9), 130048   ;;  %vm1146_vm11 = vcmask (!%p142_p9), 523264   ;;  %s7156_s11 = scalar_lea.hbm (!%p142_p9), %s7201_s3, %s5478_s24  ;;  %s5412_s19 = smov (!%p142_p9), [#allocation2]  }
  0x10   : > { %5155 = vmatprep.subr.bf16.mxu0 (!%p142_p9), %v5154_v25  ;;  %v5615_v34 = vpack.c.bf16 (!%p142_p9), %v209_v33, %v208_v32  ;;  %v211_v37 = vld [vmem:[%s7199_s1 + $0x38] sm:$0xff] (!%p142_p9)  ;;  %s5347_s20 = sshll.u32 (!%p142_p9), %s5412_s19, 4  ;;  %s5348_s20 = int_to_ptr.vmem [resolvable:$false] %s5347_s20 }
  0x11   : > { %5157 = vmatpush3.bf16.msra.mxu0 (!%p142_p9), %v5154_v25  ;;  %5174 = vmatprep.subr.bf16.mxu1 (!%p142_p9), %v5590_v28  ;;  %v5628_v38 = vpack.c.bf16 (!%p142_p9), %v211_v37, %v210_v36 }
  0x12   : > { %5159 = vmatprep.subr.bf16.mxu0 (!%p142_p9), %v5590_v28  ;;  %5178 = vmatpush3.bf16.msra.mxu1 (!%p142_p9), %v5590_v28 }
  0x13   : > { %5175 = vmatprep.subr.bf16.mxu1 (!%p142_p9), %v5603_v31 }
  0x15   : > { %s167_s25 = scalar_select %p166_p10, %s5478_s24, 63 }
  0x16   : > { %5179 = vmatpush3.bf16.msra.mxu1 %v5603_v31 }
  0x17   : > { %s4797_s26 = sshll.u32 %s167_s25, 3  ;;  %5176 = vmatprep.subr.bf16.mxu1 %v5615_v34  ;;  %s5349_s25 = scalar_lea.vmem %s5348_s20, 64 }
  0x18   : > { %s5487_s29 = scalar_lea.vmem %s7198_s0, %s4797_s26 }
  0x19   : > { %v5490_v1 = vld [vmem:[%s5487_s29 + $0x10] sm:$0xff]  ;;  %v5493_v2 = vld [vmem:[%s5487_s29] sm:$0xff]  ;;  %v5498_v3 = vld [vmem:[%s5487_s29 + $0x18] sm:$0xff] }
  0x1a   : > { %223 = vperm.xlu1 %5259, %v5490_v1   ;;  %217 = vperm.xlu0 %5258, %v5493_v2   ;;  %v5501_v4 = vld [vmem:[%s5487_s29 + $0x8] sm:$0xff]  ;;  %v5509_v6 = vld [vmem:[%s5487_s29 + $0x20] sm:$0xff]  ;;  %v5514_v7 = vld [vmem:[%s5487_s29 + $0x38] sm:$0xff] }
  0x1b   : > { %v5506_v5 = vld [vmem:[%s5487_s29 + $0x28] sm:$0xff]  ;;  %v5517_v8 = vld [vmem:[%s5487_s29 + $0x30] sm:$0xff]  ;;  %v5525_v10 = vld [vmem:[%s5487_s29 + $0x40] sm:$0xff]  ;;  %5180 = vmatpush3.bf16.msra.mxu1 %v5615_v34 }
  0x1c   : > { %v5522_v9 = vld [vmem:[%s5487_s29 + $0x48] sm:$0xff]  ;;  %v5530_v11 = vld [vmem:[%s5487_s29 + $0x58] sm:$0xff]  ;;  %v5533_v12 = vld [vmem:[%s5487_s29 + $0x50] sm:$0xff]  ;;  %5177 = vmatprep.subr.bf16.mxu1 %v5628_v38 }
  0x1d   : > { %v5538_v13 = vld [vmem:[%s5487_s29 + $0x68] sm:$0xff]  ;;  %v5541_v14 = vld [vmem:[%s5487_s29 + $0x60] sm:$0xff]  ;;  %v5546_v15 = vld [vmem:[%s5487_s29 + $0x78] sm:$0xff] }
  0x1e   : > { %226 = vperm.xlu1 %5259, %v5498_v3   ;;  %220 = vperm.xlu0 %5258, %v5501_v4   ;;  %v5549_v16 = vld [vmem:[%s5487_s29 + $0x70] sm:$0xff]  ;;  %v5554_v17 = vld [vmem:[%s5487_s29 + $0x88] sm:$0xff]  ;;  %v5557_v18 = vld [vmem:[%s5487_s29 + $0x80] sm:$0xff] }
  0x1f   : > { %v5562_v19 = vld [vmem:[%s5487_s29 + $0x90] sm:$0xff]  ;;  %v5568_v21 = vld [vmem:[%s5487_s29 + $0xa8] sm:$0xff]  ;;  %5181 = vmatpush3.bf16.msra.mxu1 %v5628_v38  ;;  %v191_v39 = vld [vmem:[%s5487_s29 + $0x98] sm:$0xff] }
  0x20   : > { %v5573_v22 = vld [vmem:[%s5487_s29 + $0xb0] sm:$0xff]  ;;  %v192_v40 = vld [vmem:[%s5487_s29 + $0xa0] sm:$0xff]  ;;  %v5663_v41 = vld [vmem:[%s5487_s29 + $0xb8] sm:$0xff] }
  0x21   : > { %v5668_v42 = vld [vmem:[%s5487_s29 + $0xc0] sm:$0xff]  ;;  %v5673_v43 = vld [vmem:[%s5487_s29 + $0xc8] sm:$0xff]  ;;  %v5681_v46 = vld [vmem:[%s5487_s29 + $0xd0] sm:$0xff] }
  0x22   : > { %232 = vperm.xlu1 %5259, %v5506_v5   ;;  %229 = vperm.xlu0 %5258, %v5509_v6   ;;  %v5684_v47 = vld [vmem:[%s5487_s29 + $0xe8] sm:$0xff]  ;;  %v5694_v50 = vld [vmem:[%s5487_s29 + $0xf0] sm:$0xff]  ;;  %v5707_v55 = vld [vmem:[%s5487_s29 + $0xd8] sm:$0xff] }
  0x23   : > { %v5723_v60 = vld [vmem:[%s5487_s29 + $0xe0] sm:$0xff] }
  0x26   : > { %238 = vperm.xlu1 %5259, %v5514_v7   ;;  %235 = vperm.xlu0 %5258, %v5517_v8  }
  0x2a   : > { %244 = vperm.xlu1 %5259, %v5522_v9   ;;  %241 = vperm.xlu0 %5258, %v5525_v10  }
  0x2e   : > { %250 = vperm.xlu1 %5259, %v5530_v11   ;;  %247 = vperm.xlu0 %5258, %v5533_v12  }
  0x32   : > { %256 = vperm.xlu1 %5259, %v5538_v13   ;;  %253 = vperm.xlu0 %5258, %v5541_v14  }
  0x36   : > { %262 = vperm.xlu1 %5259, %v5546_v15   ;;  %259 = vperm.xlu0 %5258, %v5549_v16  }
  0x3a   : > { %268 = vperm.xlu1 %5259, %v5554_v17   ;;  %265 = vperm.xlu0 %5258, %v5557_v18  }
  0x3e   : > { %5260 = vset.pattern.permute.xlu1 %v5408_v20  ;;  %271 = vperm.xlu0 %5258, %v5562_v19  }
  0x3f   : > { %633 = vperm.xlu1 %5260, %v5493_v2  }
  0x42   : > { %280 = vperm.xlu0 %5258, %v5568_v21  }
  0x43   : > { %639 = vperm.xlu1 %5260, %v5490_v1  }
  0x46   : > { %283 = vperm.xlu0 %5258, %v5573_v22  }
  0x47   : > { %642 = vperm.xlu1 %5260, %v5498_v3  }
  0x4a   : > { %5268 = vset.pattern.permute.xlu0 %v5408_v20 }
  0x4b   : > { %648 = vperm.xlu1 %5260, %v5506_v5   ;;  %636 = vperm.xlu0 %5268, %v5501_v4  }
  0x4f   : > { %654 = vperm.xlu1 %5260, %v5514_v7   ;;  %645 = vperm.xlu0 %5268, %v5509_v6  }
  0x53   : > { %5261 = vset.pattern.permute.xlu1 %v5409_v35  ;;  %651 = vperm.xlu0 %5268, %v5517_v8  }
  0x54   : > { %415 = vperm.xlu1 %5261, %v5490_v1  }
  0x57   : > { %657 = vperm.xlu0 %5268, %v5525_v10  }
  0x58   : > { %418 = vperm.xlu1 %5261, %v5498_v3   ;;  %v214_v3 = vlaneseq }
  0x5b   : > { %660 = vperm.xlu0 %5268, %v5522_v9  }
  0x5c   : > { %421 = vperm.xlu1 %5261, %v5509_v6  }
  0x5f   : > { %663 = vperm.xlu0 %5268, %v5533_v12  }
  0x60   : > { %424 = vperm.xlu1 %5261, %v5506_v5  }
  0x63   : > { %666 = vperm.xlu0 %5268, %v5530_v11  }
  0x64   : > { %427 = vperm.xlu1 %5261, %v5517_v8  }
  0x67   : > { %669 = vperm.xlu0 %5268, %v5541_v14  }
  0x68   : > { %430 = vperm.xlu1 %5261, %v5514_v7  }
  0x6b   : > { %672 = vperm.xlu0 %5268, %v5538_v13  }
  0x6c   : > { %433 = vperm.xlu1 %5261, %v5525_v10  }
  0x6f   : > { %675 = vperm.xlu0 %5268, %v5549_v16  }
  0x70   : > { %436 = vperm.xlu1 %5261, %v5522_v9  }
  0x73   : > { %678 = vperm.xlu0 %5268, %v5546_v15  }
  0x74   : > { %439 = vperm.xlu1 %5261, %v5533_v12  }
  0x77   : > { %681 = vperm.xlu0 %5268, %v5557_v18  }
  0x78   : > { %442 = vperm.xlu1 %5261, %v5530_v11  }
  0x7b   : > { %684 = vperm.xlu0 %5268, %v5554_v17  }
  0x7c   : > { %445 = vperm.xlu1 %5261, %v5541_v14   ;;  %v5767_v14 = vld [vmem:[%s5487_s29 + $0xf8] sm:$0xff]  ;;  %s162_s29 = sand.u32 1, %s5397_s13  }
  0x7d   : > { %s4795_s6 = sshll.u32 %s162_s29, 1  ;;  %s4718_s16 = scalar_lea.sflag [#allocation3], %s162_s29 }
  0x7e   : > { %s164_s7 = scalar_lea.vmem [#allocation2], %s4795_s6 }
  0x7f   : > { %687 = vperm.xlu0 %5268, %v5562_v19   ;;  %s4732_s8 = sshll.u32 %s164_s7, 4  ;;  %s7158_s8 = int_to_ptr.vmem [resolvable:$true] %s4732_s8 }
  0x80   : > { %448 = vperm.xlu1 %5261, %v5538_v13   ;;  %s5343_s17 = scalar_lea.vmem %s7158_s8, 32  ;;  %p5350_p0 = scmp.lt.s32.totalorder %s7158_s8, %s5348_s20 }
  0x81   : > { %p5344_p11 = scmp.ne.s32.totalorder %s7158_s8, %s5343_s17  ;;  %p5351_p1 = scmp.lt.s32.totalorder %s5349_s25, %s5343_s17 }
  0x83   : > { %690 = vperm.xlu0 %5268, %v191_v39   ;;  %p5345_p12 = pnand %p5344_p11, %p5468_p5  ;;  %p5352_p2 = por %p5351_p1, %p5350_p0 }
  0x84   : > { %451 = vperm.xlu1 %5261, %v5549_v16  }
  0x85   : > { %p5346_p13 = pneg %p5345_p12 }
  0x87   : > { %693 = vperm.xlu0 %5268, %v192_v40   ;;  %p5353_p3 = pnand %p5352_p2, %p5346_p13 }
  0x88   : > { %454 = vperm.xlu1 %5261, %v5546_v15  }
  0x8b   : > { %696 = vperm.xlu0 %5268, %v5568_v21  }
  0x8c   : > { %457 = vperm.xlu1 %5261, %v5557_v18  }
  0x8f   : > { %699 = vperm.xlu0 %5268, %v5573_v22  }
  0x90   : > { %460 = vperm.xlu1 %5261, %v5554_v17  }
  0x93   : > { %702 = vperm.xlu0 %5268, %v5663_v41  }
  0x94   : > { %463 = vperm.xlu1 %5261, %v5562_v19  }
  0x97   : > { %705 = vperm.xlu0 %5268, %v5668_v42  }
  0x98   : > { %5262 = vset.pattern.permute.xlu1 %v5407_v0 }
  0x99   : > { %v5675_v44 = vpop.permute.xlu1 %223  ;;  %274 = vperm.xlu1 %5262, %v191_v39   ;;  %v5677_v45 = vpop.permute.xlu0 %217 }
  0x9b   : > { %708 = vperm.xlu0 %5268, %v5673_v43  }
  0x9d   : > { %v5686_v48 = vpop.permute.xlu1 %226  ;;  %5263 = vset.pattern.permute.xlu1 %v5408_v20  ;;  %v5689_v49 = vpop.permute.xlu0 %220 }
  0x9e   : > { %711 = vperm.xlu1 %5263, %v5681_v46  }
  0x9f   : > { %720 = vperm.xlu0 %5268, %v5684_v47  }
  0xa1   : > { %v5696_v51 = vpop.permute.xlu1 %232  ;;  %v5698_v52 = vpop.permute.xlu0 %229 }
  0xa2   : > { %5264 = vset.pattern.permute.xlu1 %v5407_v0 }
  0xa3   : > { %277 = vperm.xlu1 %5264, %v192_v40   ;;  %723 = vperm.xlu0 %5268, %v5694_v50  }
  0xa5   : > { %v5702_v53 = vpop.permute.xlu1 %238  ;;  %v5704_v54 = vpop.permute.xlu0 %235 }
  0xa7   : > { %5265 = vset.pattern.permute.xlu1 %v5408_v20  ;;  %5272 = vset.pattern.permute.xlu0 %v5409_v35 }
  0xa8   : > { %714 = vperm.xlu1 %5265, %v5707_v55   ;;  %466 = vperm.xlu0 %5272, %v191_v39  }
  0xa9   : > { %v5712_v56 = vpop.permute.xlu1 %244  ;;  %v5714_v57 = vpop.permute.xlu0 %241 }
  0xac   : > { %5266 = vset.pattern.permute.xlu1 %v5409_v35  ;;  %469 = vperm.xlu0 %5272, %v192_v40  }
  0xad   : > { %v5717_v58 = vpop.permute.xlu1 %250  ;;  %472 = vperm.xlu1 %5266, %v5568_v21   ;;  %v5720_v59 = vpop.permute.xlu0 %247 }
  0xb0   : > { %481 = vperm.xlu0 %5272, %v5668_v42  }
  0xb1   : > { %v5726_v61 = vpop.permute.xlu1 %256  ;;  %5267 = vset.pattern.permute.xlu1 %v5408_v20  ;;  %v5729_v62 = vpop.permute.xlu0 %253 }
  0xb2   : > { %717 = vperm.xlu1 %5267, %v5723_v60  }
  0xb4   : > { %409 = vperm.xlu0 %5272, %v5493_v2   ;;  %v5748_v2 = vand.u32 127, %v214_v3 }
  0xb5   : > { %v5733_v63 = vpop.permute.xlu1 %262  ;;  %v5735_v1 = vpop.permute.xlu0 %259 }
  0xb6   : > { %5269 = vset.pattern.permute.xlu1 %v5409_v35  ;;  %vm314_vm7 = vcmp.eq.s32.totalorder %v5748_v2, %v5675_v44  ;;  %vm315_vm12 = vcmp.eq.s32.totalorder %v5748_v2, %v5686_v48  ;;  %vm316_vm15 = vcmp.eq.s32.totalorder %v5748_v2, %v5698_v52 }
  0xb7   : > { %475 = vperm.xlu1 %5269, %v5573_v22  }
  0xb8   : > { %412 = vperm.xlu0 %5272, %v5501_v4   ;;  %v5410_v4 = vmov 0.0  }
  0xb9   : > { %v5740_v5 = vpop.permute.xlu1 %268  ;;  %v5742_v6 = vpop.permute.xlu0 %265  ;;  %v4800_v27 = vsel %vm314_vm7, 1.0, %v5410_v4 }
  0xbb   : > { %5270 = vset.pattern.permute.xlu1 %v5407_v0 }
  0xbc   : > { %286 = vperm.xlu1 %5270, %v5663_v41   ;;  %487 = vperm.xlu0 %5272, %v5681_v46  }
  0xbd   : > { %v5750_v7 = vpop.permute.xlu0 %271 }
  0xbe   : > { %v634_v8 = vpop.permute.xlu1 %633 }
  0xbf   : > { %vm728_vm1 = vcmp.eq.s32.totalorder %v5748_v2, %v634_v8 }
  0xc0   : > { %5271 = vset.pattern.permute.xlu1 %v5409_v35  ;;  %490 = vperm.xlu0 %5272, %v5707_v55   ;;  %v4862_v9 = vsel %vm728_vm1, 1.0, %v5410_v4 }
  0xc1   : > { %478 = vperm.xlu1 %5271, %v5663_v41   ;;  %5042 = vmatprep.mubr.msk.f32.mxu0 %vm824_vm0, %v4862_v9  ;;  %v5758_v10 = vpop.permute.xlu0 %280 }
  0xc2   : > { %v640_v11 = vpop.permute.xlu1 %639 }
  0xc3   : > { %vm730_vm2 = vcmp.eq.s32.totalorder %v5748_v2, %v640_v11 }
  0xc4   : > { %493 = vperm.xlu0 %5272, %v5723_v60   ;;  %v4864_v18 = vsel %vm730_vm2, 1.0, %v5410_v4 }
  0xc5   : > { %5273 = vset.pattern.permute.xlu1 %v5407_v0  ;;  %v5762_v12 = vpop.permute.xlu0 %283 }
  0xc6   : > { %289 = vperm.xlu1 %5273, %v5668_v42   ;;  %v643_v13 = vpop.permute.xlu1 %642 }
  0xc7   : > { %vm731_vm4 = vcmp.eq.s32.totalorder %v5748_v2, %v643_v13 }
  0xc8   : > { %496 = vperm.xlu0 %5272, %v5684_v47   ;;  %v4865_v21 = vsel %vm731_vm4, 1.0, %v5410_v4 }
  0xca   : > { %5274 = vset.pattern.permute.xlu1 %v5408_v20  ;;  %v649_v15 = vpop.permute.xlu1 %648  ;;  %v637_v16 = vpop.permute.xlu0 %636 }
  0xcb   : > { %vm729_vm3 = vcmp.eq.s32.totalorder %v5748_v2, %v637_v16  ;;  %726 = vperm.xlu1 %5274, %v5767_v14   ;;  %vm733_vm6 = vcmp.eq.s32.totalorder %v5748_v2, %v649_v15 }
  0xcc   : > { %v4863_v17 = vsel %vm729_vm3, 1.0, %v5410_v4  ;;  %499 = vperm.xlu0 %5272, %v5694_v50   ;;  %v4867_v25 = vsel %vm733_vm6, 1.0, %v5410_v4  ;;  %vm317_vm3 = vcmp.eq.s32.totalorder %v5748_v2, %v5696_v51  ;;  %vm318_vm6 = vcmp.eq.s32.totalorder %v5748_v2, %v5704_v54 }
  0xcd   : > { %5043 = vmatmul.mubr.msk.f32.vlgmr.msra.gmra.mrb[0].mxu0 %vm824_vm0, %v4863_v17  ;;  %v4804_v9 = vsel %vm318_vm6, 1.0, %v5410_v4 }
  0xce   : > { %v655_v19 = vpop.permute.xlu1 %654  ;;  %5045 = vmatprep.mubr.msk.f32.mxu0 %vm824_vm0, %v4864_v18  ;;  %v646_v20 = vpop.permute.xlu0 %645  ;;  %5161 = vmatpush3.bf16.msra.mxu0 %v5590_v28 }
  0xcf   : > { %vm732_vm5 = vcmp.eq.s32.totalorder %v5748_v2, %v646_v20  ;;  %5275 = vset.pattern.permute.xlu1 %v5407_v0  ;;  %5163 = vmatprep.subr.bf16.mxu0 %v5603_v31  ;;  %vm735_vm10 = vcmp.eq.s32.totalorder %v5748_v2, %v655_v19 }
  0xd0   : > { %v4866_v22 = vsel %vm732_vm5, 1.0, %v5410_v4  ;;  %292 = vperm.xlu1 %5275, %v5673_v43   ;;  %502 = vperm.xlu0 %5272, %v5767_v14   ;;  %v4869_v32 = vsel %vm735_vm10, 1.0, %v5410_v4 }
  0xd1   : > { %5046 = vmatmul.mubr.msk.f32.gmra.mrb[2].mxu0 %vm824_vm0, %v4865_v21 }
  0xd2   : > { %v652_v23 = vpop.permute.xlu0 %651  ;;  %5048 = vmatprep.mubr.msk.f32.mxu0 %vm824_vm0, %v4866_v22  ;;  %5165 = vmatpush3.bf16.msra.mxu0 %v5603_v31 }
  0xd3   : > { %vm734_vm8 = vcmp.eq.s32.totalorder %v5748_v2, %v652_v23  ;;  %v416_v24 = vpop.permute.xlu1 %415  ;;  %5167 = vmatprep.subr.bf16.mxu0 %v5615_v34 }
  0xd4   : > { %v4868_v26 = vsel %vm734_vm8, 1.0, %v5410_v4  ;;  %vm506_vm9 = vcmp.eq.s32.totalorder %v5748_v2, %v416_v24  ;;  %5276 = vset.pattern.permute.xlu1 %v5409_v35  ;;  %5278 = vset.pattern.permute.xlu0 %v5407_v0  ;;  %v4801_v35 = vsel %vm315_vm12, 1.0, %v5410_v4 }
  0xd5   : > { %484 = vperm.xlu1 %5276, %v5673_v43   ;;  %5049 = vmatmul.mubr.msk.f32.gmra.mrb[4].mxu0 %vm824_vm0, %v4867_v25  ;;  %v4832_v28 = vsel %vm506_vm9, 1.0, %v5410_v4  ;;  %vm319_vm9 = vcmp.eq.s32.totalorder %v5748_v2, %v5702_v53 }
  0xd6   : > { %v658_v29 = vpop.permute.xlu0 %657  ;;  %5051 = vmatprep.mubr.msk.f32.mxu0 %vm824_vm0, %v4868_v26  ;;  %v602_v30 = vsub.f32 %v4800_v27, %v4832_v28  ;;  %5169 = vmatpush3.bf16.msra.mxu0 %v5615_v34  ;;  %v4805_v16 = vsel %vm319_vm9, 1.0, %v5410_v4 }
  0xd7   : > { %vm736_vm13 = vcmp.eq.s32.totalorder %v5748_v2, %v658_v29  ;;  %v419_v31 = vpop.permute.xlu1 %418  ;;  %5171 = vmatprep.subr.bf16.mxu0 %v5628_v38 }
  0xd8   : > { %v4870_v33 = vsel %vm736_vm13, 1.0, %v5410_v4  ;;  %vm507_vm14 = vcmp.eq.s32.totalorder %v5748_v2, %v419_v31  ;;  %5109 = vmatprep.mubr.msk.f32.mxu1 %vm1146_vm11, %v602_v30  ;;  %vm320_vm13 = vcmp.eq.s32.totalorder %v5748_v2, %v5714_v57 }
  0xd9   : > { %v4833_v36 = vsel %vm507_vm14, 1.0, %v5410_v4  ;;  %5277 = vset.pattern.permute.xlu1 %v5407_v0  ;;  %5052 = vmatmul.mubr.msk.f32.gmra.mrb[6].mxu0 %vm824_vm0, %v4869_v32  ;;  %v4802_v0 = vsel %vm316_vm15, 1.0, %v5410_v4  ;;  %v4806_v20 = vsel %vm320_vm13, 1.0, %v5410_v4 }
  0xda   : > { %v603_v34 = vsub.f32 %v4801_v35, %v4833_v36  ;;  %295 = vperm.xlu1 %5277, %v5681_v46   ;;  %v661_v37 = vpop.permute.xlu0 %660  ;;  %5054 = vmatprep.mubr.msk.f32.mxu0 %vm824_vm0, %v4870_v33  ;;  %v4803_v46 = vsel %vm317_vm3, 1.0, %v5410_v4 }
  0xdb   : > { %vm737_vm1 = vcmp.eq.s32.totalorder %v5748_v2, %v661_v37  ;;  %v422_v39 = vpop.permute.xlu1 %421  ;;  %5173 = vmatpush3.bf16.msra.mxu0 %v5628_v38 }
  0xdc   : > { %v4871_v40 = vsel %vm737_vm1, 1.0, %v5410_v4  ;;  %vm508_vm2 = vcmp.eq.s32.totalorder %v5748_v2, %v422_v39  ;;  %5110 = vmatmul.mubr.msk.f32.vlgmr.msra.gmra.mrb[0].mxu1 %vm1146_vm11, %v603_v34  ;;  %vm321_vm1 = vcmp.eq.s32.totalorder %v5748_v2, %v5712_v56 }
  0xdd   : > { %v4834_v41 = vsel %vm508_vm2, 1.0, %v5410_v4  ;;  %5055 = vmatmul.mubr.msk.f32.gmra.mrb[8].mxu0 %vm824_vm0, %v4871_v40  ;;  %v4807_v24 = vsel %vm321_vm1, 1.0, %v5410_v4 }
  0xde   : > { %v604_v42 = vsub.f32 %v4802_v0, %v4834_v41  ;;  %298 = vperm.xlu1 %5277, %v5707_v55   ;;  %v664_v43 = vpop.permute.xlu0 %663 }
  0xdf   : > { %vm738_vm4 = vcmp.eq.s32.totalorder %v5748_v2, %v664_v43  ;;  %v425_v38 = vpop.permute.xlu1 %424 }
  0xe0   : > { %v4872_v44 = vsel %vm738_vm4, 1.0, %v5410_v4  ;;  %vm509_vm5 = vcmp.eq.s32.totalorder %v5748_v2, %v425_v38  ;;  %5112 = vmatprep.mubr.msk.f32.mxu1 %vm1146_vm11, %v604_v42  ;;  %vm322_vm4 = vcmp.eq.s32.totalorder %v5748_v2, %v5720_v59 }
  0xe1   : > { %v4835_v48 = vsel %vm509_vm5, 1.0, %v5410_v4  ;;  %5057 = vmatprep.mubr.msk.f32.mxu0 %vm824_vm0, %v4872_v44  ;;  %v4808_v28 = vsel %vm322_vm4, 1.0, %v5410_v4 }
  0xe2   : > { %v605_v51 = vsub.f32 %v4803_v46, %v4835_v48  ;;  %301 = vperm.xlu1 %5277, %v5723_v60   ;;  %v667_v52 = vpop.permute.xlu0 %666 }
  0xe3   : > { %vm739_vm7 = vcmp.eq.s32.totalorder %v5748_v2, %v667_v52  ;;  %v428_v55 = vpop.permute.xlu1 %427 }
  0xe4   : > { %v4873_v8 = vsel %vm739_vm7, 1.0, %v5410_v4  ;;  %vm510_vm8 = vcmp.eq.s32.totalorder %v5748_v2, %v428_v55  ;;  %5113 = vmatmul.mubr.msk.f32.gmra.mrb[2].mxu1 %vm1146_vm11, %v605_v51  ;;  %vm323_vm7 = vcmp.eq.s32.totalorder %v5748_v2, %v5717_v58 }
  0xe5   : > { %v4836_v11 = vsel %vm510_vm8, 1.0, %v5410_v4  ;;  %5058 = vmatmul.mubr.msk.f32.gmra.mrb[10].mxu0 %vm824_vm0, %v4873_v8  ;;  %v4809_v33 = vsel %vm323_vm7, 1.0, %v5410_v4 }
  0xe6   : > { %v606_v54 = vsub.f32 %v4804_v9, %v4836_v11  ;;  %304 = vperm.xlu1 %5277, %v5684_v47   ;;  %v670_v60 = vpop.permute.xlu0 %669 }
  0xe7   : > { %vm740_vm10 = vcmp.eq.s32.totalorder %v5748_v2, %v670_v60  ;;  %v431_v13 = vpop.permute.xlu1 %430 }
  0xe8   : > { %v4874_v15 = vsel %vm740_vm10, 1.0, %v5410_v4  ;;  %vm511_vm12 = vcmp.eq.s32.totalorder %v5748_v2, %v431_v13  ;;  %5115 = vmatprep.mubr.msk.f32.mxu1 %vm1146_vm11, %v606_v54  ;;  %vm324_vm10 = vcmp.eq.s32.totalorder %v5748_v2, %v5729_v62 }
  0xe9   : > { %v4837_v17 = vsel %vm511_vm12, 1.0, %v5410_v4  ;;  %5060 = vmatprep.mubr.msk.f32.mxu0 %vm824_vm0, %v4874_v15  ;;  %v4810_v39 = vsel %vm324_vm10, 1.0, %v5410_v4 }
  0xea   : > { %v607_v47 = vsub.f32 %v4805_v16, %v4837_v17  ;;  %307 = vperm.xlu1 %5277, %v5694_v50   ;;  %v673_v53 = vpop.permute.xlu0 %672 }
  0xeb   : > { %vm741_vm14 = vcmp.eq.s32.totalorder %v5748_v2, %v673_v53  ;;  %v434_v18 = vpop.permute.xlu1 %433 }
  0xec   : > { %v4875_v19 = vsel %vm741_vm14, 1.0, %v5410_v4  ;;  %vm512_vm15 = vcmp.eq.s32.totalorder %v5748_v2, %v434_v18  ;;  %5116 = vmatmul.mubr.msk.f32.gmra.mrb[4].mxu1 %vm1146_vm11, %v607_v47  ;;  %vm325_vm14 = vcmp.eq.s32.totalorder %v5748_v2, %v5726_v61 }
  0xed   : > { %v4838_v21 = vsel %vm512_vm15, 1.0, %v5410_v4  ;;  %5061 = vmatmul.mubr.msk.f32.gmra.mrb[12].mxu0 %vm824_vm0, %v4875_v19  ;;  %v4811_v43 = vsel %vm325_vm14, 1.0, %v5410_v4 }
  0xee   : > { %v608_v50 = vsub.f32 %v4806_v20, %v4838_v21  ;;  %310 = vperm.xlu1 %5277, %v5767_v14   ;;  %v676_v57 = vpop.permute.xlu0 %675 }
  0xef   : > { %vm742_vm2 = vcmp.eq.s32.totalorder %v5748_v2, %v676_v57  ;;  %v437_v22 = vpop.permute.xlu1 %436 }
  0xf0   : > { %v4876_v23 = vsel %vm742_vm2, 1.0, %v5410_v4  ;;  %vm513_vm3 = vcmp.eq.s32.totalorder %v5748_v2, %v437_v22  ;;  %5118 = vmatprep.mubr.msk.f32.mxu1 %vm1146_vm11, %v608_v50  ;;  %vm326_vm2 = vcmp.eq.s32.totalorder %v5748_v2, %v5735_v1 }
  0xf1   : > { %v4839_v25 = vsel %vm513_vm3, 1.0, %v5410_v4  ;;  %5063 = vmatprep.mubr.msk.f32.mxu0 %vm824_vm0, %v4876_v23  ;;  %v4812_v51 = vsel %vm326_vm2, 1.0, %v5410_v4 }
  0xf2   : > { %v609_v56 = vsub.f32 %v4807_v24, %v4839_v25  ;;  %v679_v14 = vpop.permute.xlu0 %678 }
  0xf3   : > { %vm743_vm5 = vcmp.eq.s32.totalorder %v5748_v2, %v679_v14  ;;  %v440_v26 = vpop.permute.xlu1 %439 }
  0xf4   : > { %v4877_v27 = vsel %vm743_vm5, 1.0, %v5410_v4  ;;  %vm514_vm6 = vcmp.eq.s32.totalorder %v5748_v2, %v440_v26  ;;  %5119 = vmatmul.mubr.msk.f32.gmra.mrb[6].mxu1 %vm1146_vm11, %v609_v56  ;;  %vm327_vm5 = vcmp.eq.s32.totalorder %v5748_v2, %v5733_v63 }
  0xf5   : > { %v4840_v29 = vsel %vm514_vm6, 1.0, %v5410_v4  ;;  %5064 = vmatmul.mubr.msk.f32.gmra.mrb[14].mxu0 %vm824_vm0, %v4877_v27  ;;  %v4813_v11 = vsel %vm327_vm5, 1.0, %v5410_v4 }
  0xf6   : > { %v610_v59 = vsub.f32 %v4808_v28, %v4840_v29  ;;  %v682_v30 = vpop.permute.xlu0 %681 }
  0xf7   : > { %vm744_vm8 = vcmp.eq.s32.totalorder %v5748_v2, %v682_v30  ;;  %v443_v31 = vpop.permute.xlu1 %442 }
  0xf8   : > { %v4878_v32 = vsel %vm744_vm8, 1.0, %v5410_v4  ;;  %vm515_vm9 = vcmp.eq.s32.totalorder %v5748_v2, %v443_v31  ;;  %5121 = vmatprep.mubr.msk.f32.mxu1 %vm1146_vm11, %v610_v59  ;;  %vm328_vm8 = vcmp.eq.s32.totalorder %v5748_v2, %v5742_v6 }
  0xf9   : > { %v4841_v35 = vsel %vm515_vm9, 1.0, %v5410_v4  ;;  %5066 = vmatprep.mubr.msk.f32.mxu0 %vm824_vm0, %v4878_v32  ;;  %v4814_v16 = vsel %vm328_vm8, 1.0, %v5410_v4 }
  0xfa   : > { %v611_v58 = vsub.f32 %v4809_v33, %v4841_v35  ;;  %v685_v36 = vpop.permute.xlu0 %684 }
  0xfb   : > { %vm745_vm12 = vcmp.eq.s32.totalorder %v5748_v2, %v685_v36  ;;  %v446_v34 = vpop.permute.xlu1 %445 }
  0xfc   : > { %v4879_v37 = vsel %vm745_vm12, 1.0, %v5410_v4  ;;  %vm516_vm13 = vcmp.eq.s32.totalorder %v5748_v2, %v446_v34  ;;  %5122 = vmatmul.mubr.msk.f32.gmra.mrb[8].mxu1 %vm1146_vm11, %v611_v58  ;;  %vm329_vm12 = vcmp.eq.s32.totalorder %v5748_v2, %v5740_v5 }
  0xfd   : > { %v4842_v40 = vsel %vm516_vm13, 1.0, %v5410_v4  ;;  %5067 = vmatmul.mubr.msk.f32.gmra.mrb[16].mxu0 %vm824_vm0, %v4879_v37  ;;  %v4815_v19 = vsel %vm329_vm12, 1.0, %v5410_v4 }
  0xfe   : > { %v612_v62 = vsub.f32 %v4810_v39, %v4842_v40  ;;  %v688_v0 = vpop.permute.xlu0 %687 }
  0xff   : > { %vm746_vm15 = vcmp.eq.s32.totalorder %v5748_v2, %v688_v0  ;;  %v449_v41 = vpop.permute.xlu1 %448 }
 0x100   : > { %v4880_v42 = vsel %vm746_vm15, 1.0, %v5410_v4  ;;  %vm517_vm1 = vcmp.eq.s32.totalorder %v5748_v2, %v449_v41  ;;  %5124 = vmatprep.mubr.msk.f32.mxu1 %vm1146_vm11, %v612_v62  ;;  %vm330_vm15 = vcmp.eq.s32.totalorder %v5748_v2, %v5750_v7 }
 0x101   : > { %v4843_v38 = vsel %vm517_vm1, 1.0, %v5410_v4  ;;  %5069 = vmatprep.mubr.msk.f32.mxu0 %vm824_vm0, %v4880_v42  ;;  %v4816_v22 = vsel %vm330_vm15, 1.0, %v5410_v4 }
 0x102   : > { %v613_v61 = vsub.f32 %v4811_v43, %v4843_v38  ;;  %v691_v44 = vpop.permute.xlu0 %690 }
 0x103   : > { %vm747_vm3 = vcmp.eq.s32.totalorder %v5748_v2, %v691_v44  ;;  %v452_v46 = vpop.permute.xlu1 %451 }
 0x104   : > { %v4881_v48 = vsel %vm747_vm3, 1.0, %v5410_v4  ;;  %vm518_vm4 = vcmp.eq.s32.totalorder %v5748_v2, %v452_v46  ;;  %5125 = vmatmul.mubr.msk.f32.gmra.mrb[10].mxu1 %vm1146_vm11, %v613_v61 }
 0x105   : > { %v4844_v52 = vsel %vm518_vm4, 1.0, %v5410_v4  ;;  %5070 = vmatmul.mubr.msk.f32.gmra.mrb[18].mxu0 %vm824_vm0, %v4881_v48 }
 0x106   : > { %v614_v1 = vsub.f32 %v4812_v51, %v4844_v52  ;;  %v694_v55 = vpop.permute.xlu0 %693 }
 0x107   : > { %vm748_vm6 = vcmp.eq.s32.totalorder %v5748_v2, %v694_v55  ;;  %v455_v8 = vpop.permute.xlu1 %454 }
 0x108   : > { %v4882_v9 = vsel %vm748_vm6, 1.0, %v5410_v4  ;;  %vm519_vm7 = vcmp.eq.s32.totalorder %v5748_v2, %v455_v8  ;;  %5127 = vmatprep.mubr.msk.f32.mxu1 %vm1146_vm11, %v614_v1 }
 0x109   : > { %v4845_v54 = vsel %vm519_vm7, 1.0, %v5410_v4  ;;  %5072 = vmatprep.mubr.msk.f32.mxu0 %vm824_vm0, %v4882_v9 }
 0x10a   : > { %v615_v63 = vsub.f32 %v4813_v11, %v4845_v54  ;;  %v697_v60 = vpop.permute.xlu0 %696 }
 0x10b   : > { %vm749_vm9 = vcmp.eq.s32.totalorder %v5748_v2, %v697_v60  ;;  %v458_v13 = vpop.permute.xlu1 %457 }
 0x10c   : > { %v4883_v15 = vsel %vm749_vm9, 1.0, %v5410_v4  ;;  %vm520_vm10 = vcmp.eq.s32.totalorder %v5748_v2, %v458_v13  ;;  %5128 = vmatmul.mubr.msk.f32.gmra.mrb[12].mxu1 %vm1146_vm11, %v615_v63 }
 0x10d   : > { %v4846_v17 = vsel %vm520_vm10, 1.0, %v5410_v4  ;;  %5073 = vmatmul.mubr.msk.f32.gmra.mrb[20].mxu0 %vm824_vm0, %v4883_v15  ;;  %vm333_vm10 = vcmp.eq.s32.totalorder %v5748_v2, %v5758_v10 }
 0x10e   : > { %v616_v6 = vsub.f32 %v4814_v16, %v4846_v17  ;;  %v700_v47 = vpop.permute.xlu0 %699  ;;  %v4819_v62 = vsel %vm333_vm10, 1.0, %v5410_v4 }
 0x10f   : > { %vm750_vm13 = vcmp.eq.s32.totalorder %v5748_v2, %v700_v47  ;;  %v461_v53 = vpop.permute.xlu1 %460 }
 0x110   : > { %v4884_v18 = vsel %vm750_vm13, 1.0, %v5410_v4  ;;  %vm521_vm14 = vcmp.eq.s32.totalorder %v5748_v2, %v461_v53  ;;  %5130 = vmatprep.mubr.msk.f32.mxu1 %vm1146_vm11, %v616_v6 }
 0x111   : > { %v4847_v20 = vsel %vm521_vm14, 1.0, %v5410_v4  ;;  %5075 = vmatprep.mubr.msk.f32.mxu0 %vm824_vm0, %v4884_v18 }
 0x112   : > { %v617_v5 = vsub.f32 %v4815_v19, %v4847_v20  ;;  %v703_v21 = vpop.permute.xlu0 %702 }
 0x113   : > { %vm751_vm1 = vcmp.eq.s32.totalorder %v5748_v2, %v703_v21  ;;  %v464_v50 = vpop.permute.xlu1 %463 }
 0x114   : > { %v4885_v57 = vsel %vm751_vm1, 1.0, %v5410_v4  ;;  %vm522_vm2 = vcmp.eq.s32.totalorder %v5748_v2, %v464_v50  ;;  %5131 = vmatmul.mubr.msk.f32.gmra.mrb[14].mxu1 %vm1146_vm11, %v617_v5 }
 0x115   : > { %v4848_v23 = vsel %vm522_vm2, 1.0, %v5410_v4  ;;  %5076 = vmatmul.mubr.msk.f32.gmra.mrb[22].mxu0 %vm824_vm0, %v4885_v57  ;;  %vm334_vm2 = vcmp.eq.s32.totalorder %v5748_v2, %v5762_v12 }
 0x116   : > { %v618_v24 = vsub.f32 %v4816_v22, %v4848_v23  ;;  %v706_v25 = vpop.permute.xlu0 %705  ;;  %v4820_v46 = vsel %vm334_vm2, 1.0, %v5410_v4 }
 0x117   : > { %vm752_vm3 = vcmp.eq.s32.totalorder %v5748_v2, %v706_v25 }
 0x118   : > { %v4886_v7 = vsel %vm752_vm3, 1.0, %v5410_v4  ;;  %v275_v56 = vpop.permute.xlu1 %274  ;;  %5133 = vmatprep.mubr.msk.f32.mxu1 %vm1146_vm11, %v618_v24 }
 0x119   : > { %5078 = vmatprep.mubr.msk.f32.mxu0 %vm824_vm0, %v4886_v7  ;;  %vm331_vm6 = vcmp.eq.s32.totalorder %v5748_v2, %v275_v56 }
 0x11a   : > { %v709_v14 = vpop.permute.xlu0 %708  ;;  %v4817_v33 = vsel %vm331_vm6, 1.0, %v5410_v4 }
 0x11b   : > { %vm753_vm4 = vcmp.eq.s32.totalorder %v5748_v2, %v709_v14 }
 0x11c   : > { %v4887_v26 = vsel %vm753_vm4, 1.0, %v5410_v4 }
 0x11d   : > { %v712_v27 = vpop.permute.xlu1 %711  ;;  %5079 = vmatmul.mubr.msk.f32.gmra.mrb[24].mxu0 %vm824_vm0, %v4887_v26 }
 0x11e   : > { %vm754_vm5 = vcmp.eq.s32.totalorder %v5748_v2, %v712_v27  ;;  %v721_v28 = vpop.permute.xlu0 %720 }
 0x11f   : > { %v4888_v29 = vsel %vm754_vm5, 1.0, %v5410_v4  ;;  %vm757_vm14 = vcmp.eq.s32.totalorder %v5748_v2, %v721_v28 }
 0x120   : > { %5081 = vmatprep.mubr.msk.f32.mxu0 %vm824_vm0, %v4888_v29  ;;  %v4891_v38 = vsel %vm757_vm14, 1.0, %v5410_v4 }
 0x122   : > { %v278_v59 = vpop.permute.xlu1 %277  ;;  %v724_v30 = vpop.permute.xlu0 %723 }
 0x123   : > { %vm332_vm9 = vcmp.eq.s32.totalorder %v5748_v2, %v278_v59  ;;  %vm758_vm15 = vcmp.eq.s32.totalorder %v5748_v2, %v724_v30 }
 0x124   : > { %v4818_v39 = vsel %vm332_vm9, 1.0, %v5410_v4  ;;  %v4892_v61 = vsel %vm758_vm15, 1.0, %v5410_v4  ;;  %vm312_vm9 = vcmp.eq.s32.totalorder %v5748_v2, %v5677_v45 }
 0x125   : > { %v4798_v6 = vsel %vm312_vm9, 1.0, %v5410_v4 }
 0x127   : > { %v715_v31 = vpop.permute.xlu1 %714  ;;  %v467_v32 = vpop.permute.xlu0 %466 }
 0x128   : > { %vm755_vm7 = vcmp.eq.s32.totalorder %v5748_v2, %v715_v31  ;;  %vm523_vm8 = vcmp.eq.s32.totalorder %v5748_v2, %v467_v32 }
 0x129   : > { %v4889_v35 = vsel %vm755_vm7, 1.0, %v5410_v4  ;;  %v4849_v58 = vsel %vm523_vm8, 1.0, %v5410_v4 }
 0x12a   : > { %v619_v36 = vsub.f32 %v4817_v33, %v4849_v58  ;;  %5082 = vmatmul.mubr.msk.f32.gmra.mrb[26].mxu0 %vm824_vm0, %v4889_v35 }
 0x12b   : > { %v470_v34 = vpop.permute.xlu0 %469 }
 0x12c   : > { %vm524_vm12 = vcmp.eq.s32.totalorder %v5748_v2, %v470_v34  ;;  %v473_v37 = vpop.permute.xlu1 %472  ;;  %5134 = vmatmul.mubr.msk.f32.gmra.mrb[16].mxu1 %vm1146_vm11, %v619_v36 }
 0x12d   : > { %v4850_v40 = vsel %vm524_vm12, 1.0, %v5410_v4  ;;  %vm525_vm13 = vcmp.eq.s32.totalorder %v5748_v2, %v473_v37  ;;  %vm313_vm12 = vcmp.eq.s32.totalorder %v5748_v2, %v5689_v49 }
 0x12e   : > { %v620_v0 = vsub.f32 %v4818_v39, %v4850_v40  ;;  %v4851_v41 = vsel %vm525_vm13, 1.0, %v5410_v4  ;;  %v4799_v19 = vsel %vm313_vm12, 1.0, %v5410_v4 }
 0x12f   : > { %v621_v42 = vsub.f32 %v4819_v62, %v4851_v41  ;;  %v482_v51 = vpop.permute.xlu0 %481 }
 0x130   : > { %5136 = vmatprep.mubr.msk.f32.mxu1 %vm1146_vm11, %v620_v0  ;;  %vm528_vm6 = vcmp.eq.s32.totalorder %v5748_v2, %v482_v51 }
 0x131   : > { %v718_v10 = vpop.permute.xlu1 %717  ;;  %5137 = vmatmul.mubr.msk.f32.gmra.mrb[18].mxu1 %vm1146_vm11, %v621_v42  ;;  %v4854_v54 = vsel %vm528_vm6, 1.0, %v5410_v4 }
 0x132   : > { %vm756_vm1 = vcmp.eq.s32.totalorder %v5748_v2, %v718_v10 }
 0x133   : > { %v4890_v43 = vsel %vm756_vm1, 1.0, %v5410_v4  ;;  %v410_v55 = vpop.permute.xlu0 %409 }
 0x134   : > { %5084 = vmatprep.mubr.msk.f32.mxu0 %vm824_vm0, %v4890_v43  ;;  %vm504_vm7 = vcmp.eq.s32.totalorder %v5748_v2, %v410_v55 }
 0x135   : > { %5085 = vmatmul.mubr.msk.f32.gmra.mrb[28].mxu0 %vm824_vm0, %v4891_v38  ;;  %v4830_v16 = vsel %vm504_vm7, 1.0, %v5410_v4 }
 0x136   : > { %v476_v44 = vpop.permute.xlu1 %475  ;;  %5087 = vmatprep.mubr.msk.f32.mxu0 %vm824_vm0, %v4892_v61  ;;  %v600_v53 = vsub.f32 %v4798_v6, %v4830_v16 }
 0x137   : > { %vm526_vm3 = vcmp.eq.s32.totalorder %v5748_v2, %v476_v44  ;;  %v413_v63 = vpop.permute.xlu0 %412 }
 0x138   : > { %v4852_v48 = vsel %vm526_vm3, 1.0, %v5410_v4  ;;  %vm505_vm10 = vcmp.eq.s32.totalorder %v5748_v2, %v413_v63 }
 0x139   : > { %v622_v52 = vsub.f32 %v4820_v46, %v4852_v48  ;;  %v4831_v18 = vsel %vm505_vm10, 1.0, %v5410_v4 }
 0x13a   : > { %v601_v20 = vsub.f32 %v4799_v19, %v4831_v18 }
 0x13b   : > { %v287_v1 = vpop.permute.xlu1 %286  ;;  %5139 = vmatprep.mubr.msk.f32.mxu1 %vm1146_vm11, %v622_v52  ;;  %v488_v47 = vpop.permute.xlu0 %487 }
 0x13c   : > { %vm335_vm4 = vcmp.eq.s32.totalorder %v5748_v2, %v287_v1 }
 0x13d   : > { %v4821_v8 = vsel %vm335_vm4, 1.0, %v5410_v4 }
 0x13f   : > { %v491_v21 = vpop.permute.xlu0 %490 }
 0x140   : > { %v479_v12 = vpop.permute.xlu1 %478  ;;  %vm531_vm2 = vcmp.eq.s32.totalorder %v5748_v2, %v491_v21 }
 0x141   : > { %vm527_vm5 = vcmp.eq.s32.totalorder %v5748_v2, %v479_v12  ;;  %v4857_v27 = vsel %vm531_vm2, 1.0, %v5410_v4 }
 0x142   : > { %v4853_v9 = vsel %vm527_vm5, 1.0, %v5410_v4 }
 0x143   : > { %v623_v11 = vsub.f32 %v4821_v8, %v4853_v9  ;;  %v494_v22 = vpop.permute.xlu0 %493 }
 0x144   : > { %vm532_vm4 = vcmp.eq.s32.totalorder %v5748_v2, %v494_v22 }
 0x145   : > { %v290_v60 = vpop.permute.xlu1 %289  ;;  %5140 = vmatmul.mubr.msk.f32.gmra.mrb[20].mxu1 %vm1146_vm11, %v623_v11  ;;  %v4858_v30 = vsel %vm532_vm4, 1.0, %v5410_v4 }
 0x146   : > { %vm336_vm8 = vcmp.eq.s32.totalorder %v5748_v2, %v290_v60 }
 0x147   : > { %v4822_v13 = vsel %vm336_vm8, 1.0, %v5410_v4  ;;  %v497_v14 = vpop.permute.xlu0 %496 }
 0x148   : > { %v624_v15 = vsub.f32 %v4822_v13, %v4854_v54  ;;  %vm533_vm6 = vcmp.eq.s32.totalorder %v5748_v2, %v497_v14 }
 0x149   : > { %v4859_v58 = vsel %vm533_vm6, 1.0, %v5410_v4 }
 0x14a   : > { %v727_v17 = vpop.permute.xlu1 %726  ;;  %5142 = vmatprep.mubr.msk.f32.mxu1 %vm1146_vm11, %v624_v15 }
 0x14b   : > { %vm759_vm13 = vcmp.eq.s32.totalorder %v5748_v2, %v727_v17  ;;  %v500_v31 = vpop.permute.xlu0 %499 }
 0x14c   : > { %v4893_v45 = vsel %vm759_vm13, 1.0, %v5410_v4  ;;  %vm534_vm8 = vcmp.eq.s32.totalorder %v5748_v2, %v500_v31 }
 0x14d   : > { %5088 = vmatmul.mubr.msk.f32.gmra.mrb[30].mxu0 %vm824_vm0, %v4893_v45  ;;  %vm530_vm0 = vcmp.eq.s32.totalorder %v5748_v2, %v488_v47  ;;  %v4860_v40 = vsel %vm534_vm8, 1.0, %v5410_v4 }
 0x14e   : > { %5106 = vmatprep.mubr.msk.f32.mxu0 %vm1146_vm11, %v600_v53  ;;  %v4856_v25 = vsel %vm530_vm0, 1.0, %v5410_v4 }
 0x14f   : > { %v293_v5 = vpop.permute.xlu1 %292  ;;  %v503_v37 = vpop.permute.xlu0 %502 }
 0x150   : > { %vm337_vm14 = vcmp.eq.s32.totalorder %v5748_v2, %v293_v5  ;;  %vm535_vm10 = vcmp.eq.s32.totalorder %v5748_v2, %v503_v37 }
 0x151   : > { %5107 = vmatmul.mubr.msk.f32.vlgmr.msra.gmra.mrb[0].mxu0 %vm1146_vm11, %v601_v20  ;;  %v4823_v50 = vsel %vm337_vm14, 1.0, %v5410_v4  ;;  %v4861_v42 = vsel %vm535_vm10, 1.0, %v5410_v4 }
 0x154   : > { %v485_v49 = vpop.permute.xlu1 %484 }
 0x155   : > { %vm529_vm15 = vcmp.eq.s32.totalorder %v5748_v2, %v485_v49 }
 0x156   : > { %v4855_v57 = vsel %vm529_vm15, 1.0, %v5410_v4 }
 0x157   : > { %v625_v23 = vsub.f32 %v4823_v50, %v4855_v57 }
 0x159   : > { %v296_v24 = vpop.permute.xlu1 %295  ;;  %5143 = vmatmul.mubr.msk.f32.gmra.mrb[22].mxu1 %vm1146_vm11, %v625_v23 }
 0x15a   : > { %vm338_vm1 = vcmp.eq.s32.totalorder %v5748_v2, %v296_v24 }
 0x15b   : > { %v4824_v7 = vsel %vm338_vm1, 1.0, %v5410_v4 }
 0x15c   : > { %v626_v56 = vsub.f32 %v4824_v7, %v4856_v25 }
 0x15d   : > { %v299_v26 = vpop.permute.xlu1 %298 }
 0x15e   : > { %vm339_vm3 = vcmp.eq.s32.totalorder %v5748_v2, %v299_v26  ;;  %5145 = vmatprep.mubr.msk.f32.mxu1 %vm1146_vm11, %v626_v56 }
 0x15f   : > { %v4825_v28 = vsel %vm339_vm3, 1.0, %v5410_v4 }
 0x160   : > { %v627_v29 = vsub.f32 %v4825_v28, %v4857_v27 }
 0x161   : > { %v302_v59 = vpop.permute.xlu1 %301 }
 0x162   : > { %vm340_vm5 = vcmp.eq.s32.totalorder %v5748_v2, %v302_v59  ;;  %5146 = vmatmul.mubr.msk.f32.gmra.mrb[24].mxu1 %vm1146_vm11, %v627_v29 }
 0x163   : > { %v4826_v32 = vsel %vm340_vm5, 1.0, %v5410_v4 }
 0x164   : > { %v628_v33 = vsub.f32 %v4826_v32, %v4858_v30 }
 0x165   : > { %v305_v35 = vpop.permute.xlu1 %304 }
 0x166   : > { %vm341_vm7 = vcmp.eq.s32.totalorder %v5748_v2, %v305_v35  ;;  %5148 = vmatprep.mubr.msk.f32.mxu1 %vm1146_vm11, %v628_v33 }
 0x167   : > { %v4827_v36 = vsel %vm341_vm7, 1.0, %v5410_v4 }
 0x168   : > { %v629_v34 = vsub.f32 %v4827_v36, %v4859_v58 }
 0x169   : > { %v308_v39 = vpop.permute.xlu1 %307 }
 0x16a   : > { %vm342_vm9 = vcmp.eq.s32.totalorder %v5748_v2, %v308_v39  ;;  %5149 = vmatmul.mubr.msk.f32.gmra.mrb[26].mxu1 %vm1146_vm11, %v629_v34 }
 0x16b   : > { %v4828_v62 = vsel %vm342_vm9, 1.0, %v5410_v4 }
 0x16c   : > { %v630_v0 = vsub.f32 %v4828_v62, %v4860_v40 }
 0x16d   : > { %v311_v41 = vpop.permute.xlu1 %310 }
 0x16e   : > { %vm343_vm12 = vcmp.eq.s32.totalorder %v5748_v2, %v311_v41  ;;  %5151 = vmatprep.mubr.msk.f32.mxu1 %vm1146_vm11, %v630_v0 }
 0x16f   : > { %v4829_v10 = vsel %vm343_vm12, 1.0, %v5410_v4 }
 0x170   : > { %v631_v43 = vsub.f32 %v4829_v10, %v4861_v42 }
 0x172   : > { %5152 = vmatmul.mubr.msk.f32.gmra.mrb[28].mxu1 %vm1146_vm11, %v631_v43 }
 0x1a4   : > { %v5047_v38 = vpop.f32.mrb[2].mxu0 }
 0x1a5   : > { %v997_v61 = vpop.f32.mrb[3].mxu0 }
 0x1a8   : > { %v5050_v44 = vpop.f32.mrb[4].mxu0 }
 0x1a9   : > { %v1007_v46 = vpop.f32.mrb[5].mxu0 }
 0x1ac   : > { %v5053_v48 = vpop.f32.mrb[6].mxu0 }
 0x1ad   : > { %v1017_v51 = vpop.f32.mrb[7].mxu0 }
 0x1af   : > { %v5111_v52 = vpop.f32.mrb[0].mxu1 }
 0x1b0   : > { %v1325_v1 = vadd.f32 %v5111_v52, %v5047_v38  ;;  %v1319_v55 = vpop.f32.mrb[1].mxu1  ;;  %v5056_v12 = vpop.f32.mrb[8].mxu0 }
 0x1b1   : > { %v1320_v8 = vadd.f32 %v1319_v55, %v997_v61  ;;  %v1027_v9 = vpop.f32.mrb[9].mxu0 }
 0x1b2   : > { %v1471_v11 = vmul.f32 %v1325_v1, %v1325_v1 }
 0x1b3   : > { %v1470_v54 = vmul.f32 %v1320_v8, %v1320_v8 }
 0x1b4   : > { %1506 = vadd.xlane.f32.xlu1 %v1471_v11 }
 0x1b5   : > { %1504 = vadd.xlane.f32.xlu0 %v1470_v54 }
 0x1b7   : > { %v5114_v4 = vpop.f32.mrb[2].mxu1 }
 0x1b8   : > { %v1335_v63 = vadd.f32 %v5114_v4, %v5050_v44  ;;  %v1329_v60 = vpop.f32.mrb[3].mxu1  ;;  %v5059_v13 = vpop.f32.mrb[10].mxu0 }
 0x1b9   : > { %v1330_v15 = vadd.f32 %v1329_v60, %v1007_v46  ;;  %v1037_v16 = vpop.f32.mrb[11].mxu0 }
 0x1ba   : > { %v1473_v17 = vmul.f32 %v1335_v63, %v1335_v63 }
 0x1bb   : > { %v1472_v6 = vmul.f32 %v1330_v15, %v1330_v15 }
 0x1bc   : > { %1510 = vadd.xlane.f32.xlu1 %v1473_v17 }
 0x1bd   : > { %1508 = vadd.xlane.f32.xlu0 %v1472_v6 }
 0x1bf   : > { %v5117_v47 = vpop.f32.mrb[4].mxu1 }
 0x1c0   : > { %v1345_v53 = vadd.f32 %v5117_v47, %v5053_v48  ;;  %v5062_v18 = vpop.f32.mrb[12].mxu0  ;;  %v1339_v45 = vpop.f32.mrb[5].mxu1 }
 0x1c1   : > { %v1340_v19 = vadd.f32 %v1339_v45, %v1017_v51  ;;  %v1047_v20 = vpop.f32.mrb[13].mxu0 }
 0x1c2   : > { %v1475_v5 = vmul.f32 %v1345_v53, %v1345_v53 }
 0x1c3   : > { %v1474_v21 = vmul.f32 %v1340_v19, %v1340_v19 }
 0x1c4   : > { %1514 = vadd.xlane.f32.xlu1 %v1475_v5 }
 0x1c5   : > { %1512 = vadd.xlane.f32.xlu0 %v1474_v21 }
 0x1c7   : > { %v5120_v49 = vpop.f32.mrb[6].mxu1 }
 0x1c8   : > { %v1355_v50 = vadd.f32 %v5120_v49, %v5056_v12  ;;  %v5065_v57 = vpop.f32.mrb[14].mxu0  ;;  %v1349_v22 = vpop.f32.mrb[7].mxu1 }
 0x1c9   : > { %v1350_v23 = vadd.f32 %v1349_v22, %v1027_v9  ;;  %v1057_v24 = vpop.f32.mrb[15].mxu0 }
 0x1ca   : > { %v1477_v25 = vmul.f32 %v1355_v50, %v1355_v50 }
 0x1cb   : > { %v1476_v7 = vmul.f32 %v1350_v23, %v1350_v23 }
 0x1cc   : > { %1518 = vadd.xlane.f32.xlu1 %v1477_v25 }
 0x1cd   : > { %1516 = vadd.xlane.f32.xlu0 %v1476_v7 }
 0x1cf   : > { %v5123_v56 = vpop.f32.mrb[8].mxu1 }
 0x1d0   : > { %v1365_v14 = vadd.f32 %v5123_v56, %v5059_v13  ;;  %v5068_v26 = vpop.f32.mrb[16].mxu0  ;;  %v1359_v27 = vpop.f32.mrb[9].mxu1 }
 0x1d1   : > { %v1360_v28 = vadd.f32 %v1359_v27, %v1037_v16  ;;  %v1067_v29 = vpop.f32.mrb[17].mxu0 }
 0x1d2   : > { %v1479_v59 = vmul.f32 %v1365_v14, %v1365_v14 }
 0x1d3   : > { %v1478_v30 = vmul.f32 %v1360_v28, %v1360_v28 }
 0x1d4   : > { %1522 = vadd.xlane.f32.xlu0 %v1479_v59 }
 0x1d7   : > { %v5126_v31 = vpop.f32.mrb[10].mxu1 }
 0x1d8   : > { %v6066_v32 = vadd.f32 %v5126_v31, %v5062_v18  ;;  %v1369_v33 = vpop.f32.mrb[11].mxu1  ;;  %1520 = vadd.xlane.f32.xlu0 %v1478_v30  ;;  %v5071_v35 = vpop.f32.mrb[18].mxu0 }
 0x1d9   : > { %v6068_v58 = vadd.f32 %v1369_v33, %v1047_v20  ;;  %v1077_v36 = vpop.f32.mrb[19].mxu0 }
 0x1da   : > { %v1481_v30 = vmul.f32 %v6066_v32, %v6066_v32 }
 0x1db   : > { %v1480_v28 = vmul.f32 %v6068_v58, %v6068_v58 }
 0x1df   : > { %v5129_v34 = vpop.f32.mrb[12].mxu1 }
 0x1e0   : > { %v6070_v37 = vadd.f32 %v5129_v34, %v5065_v57  ;;  %v5074_v39 = vpop.f32.mrb[20].mxu0  ;;  %v1379_v40 = vpop.f32.mrb[13].mxu1 }
 0x1e1   : > { %v6072_v62 = vadd.f32 %v1379_v40, %v1057_v24  ;;  %v1087_v0 = vpop.f32.mrb[21].mxu0 }
 0x1e3   : > { %v1482_v34 = vmul.f32 %v6072_v62, %v6072_v62  ;;  %v6083_v62 = vshrl.u32 %v214_v3, 7 }
 0x1e7   : > { %v5132_v41 = vpop.f32.mrb[14].mxu1 }
 0x1e8   : > { %v1395_v42 = vadd.f32 %v5132_v41, %v5068_v26  ;;  %v5077_v10 = vpop.f32.mrb[22].mxu0  ;;  %v1389_v43 = vpop.f32.mrb[15].mxu1  ;;  %v1483_v41 = vmul.f32 %v6070_v37, %v6070_v37  ;;  %v5411_v37 = vmov 1966171168  }
 0x1e9   : > { %v1390_v38 = vadd.f32 %v1389_v43, %v1067_v29  ;;  %v1097_v61 = vpop.f32.mrb[23].mxu0 }
 0x1ea   : > { %v1485_v44 = vmul.f32 %v1395_v42, %v1395_v42 }
 0x1eb   : > { %v1484_v46 = vmul.f32 %v1390_v38, %v1390_v38 }
 0x1ec   : > { %1534 = vadd.xlane.f32.xlu0 %v1485_v44 }
 0x1ed   : > { %1532 = vadd.xlane.f32.xlu1 %v1484_v46 }
 0x1f0   : > { %v5080_v48 = vpop.f32.mrb[24].mxu0 }
 0x1f1   : > { %v1107_v51 = vpop.f32.mrb[25].mxu0 }
 0x1fd   : > { %v5083_v52 = vpop.f32.mrb[26].mxu0 }
 0x1fe   : > { %v1117_v1 = vpop.f32.mrb[27].mxu0 }
 0x1ff   : > { %v5135_v55 = vpop.f32.mrb[16].mxu1 }
 0x200   : > { %v1405_v12 = vadd.f32 %v5135_v55, %v5071_v35  ;;  %v1399_v8 = vpop.f32.mrb[17].mxu1  ;;  %v6098_v55 = vsub.s32 2, %v6083_v62 }
 0x201   : > { %v1400_v9 = vadd.f32 %v1399_v8, %v1077_v36 }
 0x202   : > { %v1487_v11 = vmul.f32 %v1405_v12, %v1405_v12 }
 0x203   : > { %v1486_v54 = vmul.f32 %v1400_v9, %v1400_v9 }
 0x204   : > { %1538 = vadd.xlane.f32.xlu0 %v1487_v11  ;;  %v5138_v4 = vpop.f32.mrb[18].mxu1  ;;  %v6101_v11 = vsub.s32 3, %v6083_v62 }
 0x205   : > { %v1415_v63 = vadd.f32 %v5138_v4, %v5074_v39  ;;  %1536 = vadd.xlane.f32.xlu1 %v1486_v54  ;;  %v1409_v60 = vpop.f32.mrb[19].mxu1  ;;  %v6104_v54 = vsub.s32 4, %v6083_v62 }
 0x206   : > { %v1410_v13 = vadd.f32 %v1409_v60, %v1087_v0  ;;  %v6107_v60 = vsub.s32 5, %v6083_v62 }
 0x207   : > { %v1489_v15 = vmul.f32 %v1415_v63, %v1415_v63 }
 0x208   : > { %v1488_v16 = vmul.f32 %v1410_v13, %v1410_v13  ;;  %v5086_v17 = vpop.f32.mrb[28].mxu0 }
 0x209   : > { %v1127_v6 = vpop.f32.mrb[29].mxu0  ;;  %1542 = vadd.xlane.f32.xlu0 %v1489_v15 }
 0x20a   : > { %1540 = vadd.xlane.f32.xlu1 %v1488_v16 }
 0x218   : > { %v5141_v47 = vpop.f32.mrb[20].mxu1 }
 0x219   : > { %v1425_v53 = vadd.f32 %v5141_v47, %v5077_v10  ;;  %v1419_v18 = vpop.f32.mrb[21].mxu1  ;;  %v6113_v47 = vsub.s32 7, %v6083_v62 }
 0x21a   : > { %v1420_v45 = vadd.f32 %v1419_v18, %v1097_v61 }
 0x21b   : > { %v1491_v19 = vmul.f32 %v1425_v53, %v1425_v53 }
 0x21c   : > { %v1490_v20 = vmul.f32 %v1420_v45, %v1420_v45 }
 0x21d   : > { %1546 = vadd.xlane.f32.xlu0 %v1491_v19 }
 0x21e   : > { %1544 = vadd.xlane.f32.xlu1 %v1490_v20 }
 0x220   : > { %v5089_v5 = vpop.f32.mrb[30].mxu0 }
 0x221   : > { %v1137_v21 = vpop.f32.mrb[31].mxu0 }
 0x224   : > { %v5108_v49 = vpop.f32.mrb[0].mxu0 }
 0x225   : > { %v1309_v50 = vpop.f32.mrb[1].mxu0  ;;  %v1469_v56 = vmul.f32 %v5108_v49, %v5108_v49 }
 0x226   : > { %v1468_v61 = vmul.f32 %v1309_v50, %v1309_v50 }
 0x22c   : > { %v5144_v57 = vpop.f32.mrb[22].mxu1 }
 0x22d   : > { %v1435_v22 = vadd.f32 %v5144_v57, %v5080_v48  ;;  %v1429_v23 = vpop.f32.mrb[23].mxu1  ;;  %v2849_v48 = vunpack.c.l.s4 %v5411_v37 }
 0x22e   : > { %v1430_v24 = vadd.f32 %v1429_v23, %v1107_v51 }
 0x22f   : > { %v1493_v25 = vmul.f32 %v1435_v22, %v1435_v22  ;;  %v2850_v15 = vunpack.c.0.s8 %v2849_v48 }
 0x230   : > { %v1492_v7 = vmul.f32 %v1430_v24, %v1430_v24 }
 0x231   : > { %1550 = vadd.xlane.f32.xlu0 %v1493_v25  ;;  %v6125_v50 = vsub.s32 %v2850_v15, %v6083_v62 }
 0x232   : > { %1548 = vadd.xlane.f32.xlu1 %v1492_v7 }
 0x235   : > { %1502 = vadd.xlane.f32.xlu0 %v1469_v56  ;;  %v5147_v14 = vpop.f32.mrb[24].mxu1 }
 0x236   : > { %v1445_v26 = vadd.f32 %v5147_v14, %v5083_v52  ;;  %v1439_v27 = vpop.f32.mrb[25].mxu1  ;;  %v6092_v52 = vsub.s32 0, %v6083_v62 }
 0x237   : > { %v1440_v29 = vadd.f32 %v1439_v27, %v1117_v1  ;;  %v6095_v1 = vsub.s32 1, %v6083_v62 }
 0x238   : > { %v1495_v59 = vmul.f32 %v1445_v26, %v1445_v26 }
 0x239   : > { %1524 = vadd.xlane.f32.xlu0 %v1480_v28  ;;  %v1494_v31 = vmul.f32 %v1440_v29, %v1440_v29 }
 0x23a   : > { %1554 = vadd.xlane.f32.xlu1 %v1495_v59 }
 0x23d   : > { %1526 = vadd.xlane.f32.xlu0 %v1481_v30  ;;  %v5150_v33 = vpop.f32.mrb[26].mxu1 }
 0x23e   : > { %v1455_v35 = vadd.f32 %v5150_v33, %v5086_v17  ;;  %1552 = vadd.xlane.f32.xlu1 %v1494_v31  ;;  %v1449_v36 = vpop.f32.mrb[27].mxu1 }
 0x23f   : > { %v1450_v39 = vadd.f32 %v1449_v36, %v1127_v6  ;;  %v6110_v6 = vsub.s32 6, %v6083_v62 }
 0x240   : > { %v1497_v32 = vmul.f32 %v1455_v35, %v1455_v35 }
 0x241   : > { %v1496_v40 = vmul.f32 %v1450_v39, %v1450_v39  ;;  %v1507_v0 = vpop.xlane.xlu1 %1506  ;;  %1528 = vadd.xlane.f32.xlu0 %v1482_v34 }
 0x242   : > { %5279 = vrsqrt.f32 %v1507_v0  ;;  %v1505_v58 = vpop.xlane.xlu0 %1504  ;;  %vm1587_vm11 = vcmp.eq.f32.partialorder %v1507_v0, inf  ;;  %v1590_v4 = vand.u32 2147483648, %v1507_v0  ;;  %vm1589_vm13 = vcmp.eq.f32.partialorder %v1507_v0, 0.0 }
 0x243   : > { %5281 = vrsqrt.f32 %v1505_v58  ;;  %1556 = vadd.xlane.f32.xlu1 %v1496_v40  ;;  %vm1580_vm14 = vcmp.eq.f32.partialorder %v1505_v58, inf  ;;  %v1583_v53 = vand.u32 2147483648, %v1505_v58  ;;  %vm1582_vm15 = vcmp.eq.f32.partialorder %v1505_v58, 0.0 }
 0x245   : > { %1530 = vadd.xlane.f32.xlu0 %v1483_v41  ;;  %v5153_v42 = vpop.f32.mrb[28].mxu1 }
 0x246   : > { %v1465_v10 = vadd.f32 %v5153_v42, %v5089_v5  ;;  %v1459_v43 = vpop.f32.mrb[29].mxu1 }
 0x247   : > { %v1460_v38 = vadd.f32 %v1459_v43, %v1137_v21  ;;  %1558 = vadd.xlane.f32.xlu1 %v1497_v32 }
 0x248   : > { %v1499_v18 = vmul.f32 %v1465_v10, %v1465_v10 }
 0x249   : > { %v6085_v44 = vpop.xlane.xlu1 %1510  ;;  %v1498_v9 = vmul.f32 %v1460_v38, %v1460_v38 }
 0x24a   : > { %5283 = vrsqrt.f32 %v6085_v44  ;;  %v6088_v46 = vpop.xlane.xlu0 %1508  ;;  %vm1601_vm0 = vcmp.eq.f32.partialorder %v6085_v44, inf  ;;  %vm1603_vm1 = vcmp.eq.f32.partialorder %v6085_v44, 0.0  ;;  %v1604_v27 = vand.u32 2147483648, %v6085_v44 }
 0x24b   : > { %5285 = vrsqrt.f32 %v6088_v46  ;;  %1500 = vadd.xlane.f32.xlu1 %v1468_v61  ;;  %vm1594_vm2 = vcmp.eq.f32.partialorder %v6088_v46, inf  ;;  %vm1596_vm3 = vcmp.eq.f32.partialorder %v6088_v46, 0.0  ;;  %v1597_v32 = vand.u32 2147483648, %v6088_v46 }
 0x24c   : > { %v5280_v51 = vpop.eup %5279 }
 0x24d   : > { %v5282_v12 = vpop.eup %5281  ;;  %v1586_v8 = vmul.f32 %v5280_v51, %v1507_v0 }
 0x24e   : > { %v1579_v63 = vmul.f32 %v5282_v12, %v1505_v58 }
 0x24f   : > { %v1588_v13 = vsel %vm1587_vm11, %v1507_v0, %v1586_v8  ;;  %1560 = vadd.xlane.f32.xlu1 %v1498_v9 }
 0x250   : > { %v1591_v16 = vsel %vm1589_vm13, %v1590_v4, %v1588_v13  ;;  %v1581_v17 = vsel %vm1580_vm14, %v1505_v58, %v1579_v63 }
 0x251   : > { %v6115_v45 = vpop.xlane.xlu1 %1514  ;;  %v1919_v19 = vrot.slane %v1591_v16, %v6092_v52  ;;  %v1923_v20 = vrot.slane %v1591_v16, %v6095_v1  ;;  %v1927_v21 = vrot.slane %v1591_v16, %v6098_v55  ;;  %v1584_v49 = vsel %vm1582_vm15, %v1583_v53, %v1581_v17 }
 0x252   : > { %5287 = vrsqrt.f32 %v6115_v45  ;;  %v6120_v5 = vpop.xlane.xlu0 %1512  ;;  %v1931_v22 = vrot.slane %v1591_v16, %v6101_v11  ;;  %v1935_v23 = vrot.slane %v1591_v16, %v6104_v54  ;;  %v1939_v24 = vrot.slane %v1591_v16, %v6107_v60 }
 0x253   : > { %5289 = vrsqrt.f32 %v6120_v5  ;;  %1562 = vadd.xlane.f32.xlu1 %v1499_v18  ;;  %v1943_v25 = vrot.slane %v1591_v16, %v6110_v6  ;;  %v1947_v14 = vrot.slane %v1591_v16, %v6113_v47  ;;  %v2991_v26 = vcombine.low %v1919_v19, %v1923_v20 }
 0x254   : > { %v5284_v57 = vpop.eup %5283  ;;  %v2992_v28 = vcombine.low %v1927_v21, %v1931_v22  ;;  %v2993_v29 = vcombine.low %v1935_v23, %v1939_v24  ;;  %v1887_v31 = vrot.slane %v1584_v49, %v6092_v52  ;;  %v1891_v0 = vrot.slane %v1584_v49, %v6095_v1 }
 0x255   : > { %v5286_v7 = vpop.eup %5285  ;;  %v1600_v56 = vmul.f32 %v5284_v57, %v6085_v44  ;;  %v2994_v30 = vcombine.low %v1943_v25, %v1947_v14  ;;  %v3001_v35 = vrot.slane %v2991_v26, %v6125_v50  ;;  %v1895_v58 = vrot.slane %v1584_v49, %v6098_v55 }
 0x256   : > { %v1593_v59 = vmul.f32 %v5286_v7, %v6088_v46  ;;  %v3008_v36 = vrot.slane %v2992_v28, %v6125_v50  ;;  %v3015_v34 = vrot.slane %v2993_v29, %v6125_v50  ;;  %v1899_v41 = vrot.slane %v1584_v49, %v6101_v11 }
 0x257   : > { %v1602_v33 = vsel %vm1601_vm0, %v6085_v44, %v1600_v56  ;;  %v3022_v40 = vrot.slane %v2994_v30, %v6125_v50  ;;  %v1903_v10 = vrot.slane %v1584_v49, %v6104_v54  ;;  %vm1615_vm4 = vcmp.eq.f32.partialorder %v6115_v45, inf }
 0x258   : > { %v6157_v43 = vsel %vm1603_vm1, %v1604_v27, %v1602_v33  ;;  %v1595_v38 = vsel %vm1594_vm2, %v6088_v46, %v1593_v59  ;;  %v3023_v37 = vcombine.low %v3001_v35, %v3008_v36  ;;  %v1907_v51 = vrot.slane %v1584_v49, %v6107_v60 }
 0x259   : > { %v6143_v39 = vpop.xlane.xlu1 %1518  ;;  %v3024_v48 = vcombine.low %v3015_v34, %v3022_v40  ;;  %v1911_v12 = vrot.slane %v1584_v49, %v6110_v6  ;;  %vm1617_vm5 = vcmp.eq.f32.partialorder %v6115_v45, 0.0  ;;  %v1915_v9 = vrot.slane %v1584_v49, %v6113_v47 }
 0x25a   : > { %5291 = vrsqrt.f32 %v6143_v39  ;;  %v6152_v42 = vpop.xlane.xlu0 %1516  ;;  %v2942_v4 = vcombine.low %v1887_v31, %v1891_v0  ;;  %v2943_v63 = vcombine.low %v1895_v58, %v1899_v41  ;;  %v3031_v15 = vrot.slane %v3023_v37, %v6125_v50 }
 0x25b   : > { %5293 = vrsqrt.f32 %v6152_v42  ;;  %v3038_v16 = vrot.slane %v3024_v48, %v6125_v50  ;;  %v2944_v17 = vcombine.low %v1903_v10, %v1907_v51  ;;  %v1618_v53 = vand.u32 2147483648, %v6115_v45 }
 0x25c   : > { %v5288_v61 = vpop.eup %5287  ;;  %v2945_v18 = vcombine.low %v1911_v12, %v1915_v9  ;;  %v2952_v19 = vrot.slane %v2942_v4, %v6125_v50  ;;  %v2959_v20 = vrot.slane %v2943_v63, %v6125_v50  ;;  %vm1608_vm6 = vcmp.eq.f32.partialorder %v6120_v5, inf }
 0x25d   : > { %v5290_v8 = vpop.eup %5289  ;;  %v1614_v44 = vmul.f32 %v5288_v61, %v6115_v45  ;;  %vm1610_vm7 = vcmp.eq.f32.partialorder %v6120_v5, 0.0  ;;  %v1611_v21 = vand.u32 2147483648, %v6120_v5  ;;  %v2966_v49 = vrot.slane %v2944_v17, %v6125_v50 }
 0x25e   : > { %v1607_v13 = vmul.f32 %v5290_v8, %v6120_v5  ;;  %v6181_v57 = vsel %vm1596_vm3, %v1597_v32, %v1595_v38  ;;  %v2973_v23 = vrot.slane %v2945_v18, %v6125_v50  ;;  %v2974_v24 = vcombine.low %v2952_v19, %v2959_v20 }
 0x25f   : > { %v1983_v25 = vrot.slane %v6157_v43, %v6092_v52  ;;  %v1616_v7 = vsel %vm1615_vm4, %v6115_v45, %v1614_v44  ;;  %v3039_v14 = vcombine.low %v3031_v15, %v3038_v16  ;;  %v1987_v27 = vrot.slane %v6157_v43, %v6095_v1 }
 0x260   : > { %v1609_v56 = vsel %vm1608_vm6, %v6120_v5, %v1607_v13  ;;  %v2975_v46 = vcombine.low %v2966_v49, %v2973_v23  ;;  %v2982_v26 = vrot.slane %v2974_v24, %v6125_v50  ;;  %v1991_v28 = vrot.slane %v6157_v43, %v6098_v55 }
 0x261   : > { %v6183_v22 = vpop.xlane.xlu0 %1522  ;;  %v1995_v59 = vrot.slane %v6157_v43, %v6101_v11  ;;  %v1999_v30 = vrot.slane %v6157_v43, %v6104_v54  ;;  %v2003_v31 = vrot.slane %v6157_v43, %v6107_v60  ;;  %v2007_v33 = vrot.slane %v6157_v43, %v6110_v6 }
 0x262   : > { %5295 = vrsqrt.f32 %v6183_v22  ;;  %v2989_v40 = vrot.slane %v2975_v46, %v6125_v50  ;;  %v2011_v0 = vrot.slane %v6157_v43, %v6113_v47  ;;  %v3089_v58 = vcombine.low %v1983_v25, %v1987_v27 }
 0x263   : > { %v6214_v41 = vsel %vm1617_vm5, %v1618_v53, %v1616_v7  ;;  %vm1629_vm8 = vcmp.eq.f32.partialorder %v6143_v39, inf  ;;  %v1632_v32 = vand.u32 2147483648, %v6143_v39  ;;  %v1625_v10 = vand.u32 2147483648, %v6152_v42 }
 0x264   : > { %v5292_v29 = vpop.eup %5291  ;;  %4422 = vperm.xlu1 %5277, %v3039_v14   ;;  %v6221_v38 = vsel %vm1610_vm7, %v1611_v21, %v1609_v56  ;;  %vm1631_vm9 = vcmp.eq.f32.partialorder %v6143_v39, 0.0  ;;  %v2990_v43 = vcombine.low %v2982_v26, %v2989_v40  ;;  %v3090_v61 = vcombine.low %v1991_v28, %v1995_v59 }
 0x265   : > { %v5294_v35 = vpop.eup %5293  ;;  %v1628_v36 = vmul.f32 %v5292_v29, %v6143_v39  ;;  %v6207_v34 = vpop.xlane.xlu0 %1520  ;;  %vm1622_vm10 = vcmp.eq.f32.partialorder %v6152_v42, inf  ;;  %v1646_v37 = vand.u32 2147483648, %v6183_v22  ;;  %v3091_v48 = vcombine.low %v1999_v30, %v2003_v31 }
 0x266   : > { %5297 = vrsqrt.f32 %v6207_v34  ;;  %v1621_v45 = vmul.f32 %v5294_v35, %v6152_v42  ;;  %v3092_v51 = vcombine.low %v2007_v33, %v2011_v0  ;;  %v3099_v5 = vrot.slane %v3089_v58, %v6125_v50 }
 0x267   : > { %v1630_v12 = vsel %vm1629_vm8, %v6143_v39, %v1628_v36  ;;  %v3106_v8 = vrot.slane %v3090_v61, %v6125_v50  ;;  %v1951_v44 = vrot.slane %v6181_v57, %v6092_v52  ;;  %vm1643_vm12 = vcmp.eq.f32.partialorder %v6183_v22, inf }
 0x268   : > { %4419 = vperm.xlu1 %5277, %v2990_v43   ;;  %v3113_v9 = vrot.slane %v3091_v48, %v6125_v50  ;;  %v3120_v4 = vrot.slane %v3092_v51, %v6125_v50  ;;  %v1955_v63 = vrot.slane %v6181_v57, %v6095_v1  ;;  %v1959_v13 = vrot.slane %v6181_v57, %v6098_v55 }
 0x269   : > { %v3121_v15 = vcombine.low %v3099_v5, %v3106_v8  ;;  %v1963_v16 = vrot.slane %v6181_v57, %v6101_v11  ;;  %v1967_v17 = vrot.slane %v6181_v57, %v6104_v54  ;;  %v1971_v53 = vrot.slane %v6181_v57, %v6107_v60 }
 0x26a   : > { %v3122_v19 = vcombine.low %v3113_v9, %v3120_v4  ;;  %v1975_v20 = vrot.slane %v6181_v57, %v6110_v6  ;;  %v1979_v21 = vrot.slane %v6181_v57, %v6113_v47  ;;  %v3040_v49 = vcombine.low %v1951_v44, %v1955_v63 }
 0x26b   : > { %v1639_v23 = vand.u32 2147483648, %v6207_v34  ;;  %v3129_v24 = vrot.slane %v3121_v15, %v6125_v50  ;;  %v3041_v25 = vcombine.low %v1959_v13, %v1963_v16  ;;  %v3042_v7 = vcombine.low %v1967_v17, %v1971_v53 }
 0x26c   : > { %v5296_v18 = vpop.eup %5295  ;;  %v3136_v14 = vrot.slane %v3122_v19, %v6125_v50  ;;  %v3043_v46 = vcombine.low %v1975_v20, %v1979_v21  ;;  %v3050_v26 = vrot.slane %v3040_v49, %v6125_v50  ;;  %v2047_v57 = vrot.slane %v6214_v41, %v6092_v52 }
 0x26d   : > { %v1642_v56 = vmul.f32 %v5296_v18, %v6183_v22  ;;  %v3057_v27 = vrot.slane %v3041_v25, %v6125_v50  ;;  %v3064_v28 = vrot.slane %v3042_v7, %v6125_v50  ;;  %v2051_v29 = vrot.slane %v6214_v41, %v6095_v1 }
 0x26e   : > { %v1633_v59 = vsel %vm1631_vm9, %v1632_v32, %v1630_v12  ;;  %v3137_v30 = vcombine.low %v3129_v24, %v3136_v14  ;;  %v3071_v31 = vrot.slane %v3043_v46, %v6125_v50  ;;  %v2055_v33 = vrot.slane %v6214_v41, %v6098_v55 }
 0x26f   : > { %v6269_v36 = vsel %vm1622_vm10, %v6152_v42, %v1621_v45  ;;  %v3072_v40 = vcombine.low %v3050_v26, %v3057_v27  ;;  %v2059_v0 = vrot.slane %v6214_v41, %v6101_v11  ;;  %v2063_v39 = vrot.slane %v6214_v41, %v6104_v54 }
 0x270   : > { %v5298_v35 = vpop.eup %5297  ;;  %4428 = vperm.xlu1 %5277, %v3137_v30   ;;  %v3073_v58 = vcombine.low %v3064_v28, %v3071_v31  ;;  %v2067_v32 = vrot.slane %v6214_v41, %v6107_v60  ;;  %v2071_v43 = vrot.slane %v6214_v41, %v6110_v6  ;;  %v2075_v61 = vrot.slane %v6214_v41, %v6113_v47 }
 0x271   : > { %v6284_v45 = vsel %vm1643_vm12, %v6183_v22, %v1642_v56  ;;  %v3080_v48 = vrot.slane %v3072_v40, %v6125_v50  ;;  %v3187_v51 = vcombine.low %v2047_v57, %v2051_v29  ;;  %v3188_v12 = vcombine.low %v2055_v33, %v2059_v0 }
 0x272   : > { %v1635_v5 = vmul.f32 %v5298_v35, %v6207_v34  ;;  %v3087_v8 = vrot.slane %v3073_v58, %v6125_v50  ;;  %v3189_v44 = vcombine.low %v2063_v39, %v2067_v32  ;;  %v3190_v9 = vcombine.low %v2071_v43, %v2075_v61 }
 0x273   : > { %v3197_v4 = vrot.slane %v3187_v51, %v6125_v50  ;;  %v3204_v63 = vrot.slane %v3188_v12, %v6125_v50  ;;  %v2111_v41 = vrot.slane %v1633_v59, %v6092_v52  ;;  %v2115_v13 = vrot.slane %v1633_v59, %v6095_v1 }
 0x274   : > { %vm1636_vm11 = vcmp.eq.f32.partialorder %v6207_v34, inf  ;;  %v3088_v15 = vcombine.low %v3080_v48, %v3087_v8  ;;  %v3211_v16 = vrot.slane %v3189_v44, %v6125_v50  ;;  %v3218_v17 = vrot.slane %v3190_v9, %v6125_v50 }
 0x275   : > { %v2119_v53 = vrot.slane %v1633_v59, %v6098_v55  ;;  %vm1624_vm13 = vcmp.eq.f32.partialorder %v6152_v42, 0.0  ;;  %v3219_v18 = vcombine.low %v3197_v4, %v3204_v63  ;;  %v2123_v19 = vrot.slane %v1633_v59, %v6101_v11 }
 0x276   : > { %v2127_v20 = vrot.slane %v1633_v59, %v6104_v54  ;;  %v2131_v21 = vrot.slane %v1633_v59, %v6107_v60  ;;  %4425 = vperm.xlu1 %5277, %v3088_v15   ;;  %v3220_v49 = vcombine.low %v3211_v16, %v3218_v17  ;;  %v2135_v24 = vrot.slane %v1633_v59, %v6110_v6 }
 0x277   : > { %v2139_v25 = vrot.slane %v1633_v59, %v6113_v47  ;;  %v3285_v7 = vcombine.low %v2111_v41, %v2115_v13  ;;  %v3227_v56 = vrot.slane %v3219_v18, %v6125_v50  ;;  %v3286_v14 = vcombine.low %v2119_v53, %v2123_v19 }
 0x278   : > { %v3287_v46 = vcombine.low %v2127_v20, %v2131_v21  ;;  %v2015_v26 = vrot.slane %v6221_v38, %v6092_v52  ;;  %v3234_v27 = vrot.slane %v3220_v49, %v6125_v50  ;;  %v2019_v29 = vrot.slane %v6221_v38, %v6095_v1 }
 0x279   : > { %v3288_v28 = vcombine.low %v2135_v24, %v2139_v25  ;;  %v3295_v57 = vrot.slane %v3285_v7, %v6125_v50  ;;  %v3302_v30 = vrot.slane %v3286_v14, %v6125_v50  ;;  %v2023_v31 = vrot.slane %v6221_v38, %v6098_v55  ;;  %v6316_v35 = vpop.xlane.xlu0 %1534 }
 0x27a   : > { %v3309_v59 = vrot.slane %v3287_v46, %v6125_v50  ;;  %v2027_v33 = vrot.slane %v6221_v38, %v6101_v11  ;;  %v3235_v40 = vcombine.low %v3227_v56, %v3234_v27  ;;  %v2031_v39 = vrot.slane %v6221_v38, %v6104_v54  ;;  %v6328_v44 = vpop.xlane.xlu1 %1532 }
 0x27b   : > { %v3316_v0 = vrot.slane %v3288_v28, %v6125_v50  ;;  %v2035_v58 = vrot.slane %v6221_v38, %v6107_v60  ;;  %v3317_v32 = vcombine.low %v3295_v57, %v3302_v30  ;;  %v2039_v43 = vrot.slane %v6221_v38, %v6110_v6 }
 0x27c   : > { %v2043_v61 = vrot.slane %v6221_v38, %v6113_v47  ;;  %v3138_v48 = vcombine.low %v2015_v26, %v2019_v29  ;;  %4434 = vperm.xlu1 %5277, %v3235_v40   ;;  %v3139_v12 = vcombine.low %v2023_v31, %v2027_v33  ;;  %5299 = vrsqrt.f32 %v6316_v35 }
 0x27d   : > { %v3318_v51 = vcombine.low %v3309_v59, %v3316_v0  ;;  %v3140_v8 = vcombine.low %v2031_v39, %v2035_v58  ;;  %v1637_v9 = vsel %vm1636_vm11, %v6207_v34, %v1635_v5  ;;  %v3325_v4 = vrot.slane %v3317_v32, %v6125_v50 }
 0x27e   : > { %v3141_v63 = vcombine.low %v2039_v43, %v2043_v61  ;;  %v3148_v41 = vrot.slane %v3138_v48, %v6125_v50  ;;  %v1626_v38 = vsel %vm1624_vm13, %v1625_v10, %v6269_v36  ;;  %v3155_v15 = vrot.slane %v3139_v12, %v6125_v50 }
 0x27f   : > { %v3332_v13 = vrot.slane %v3318_v51, %v6125_v50  ;;  %v3162_v16 = vrot.slane %v3140_v8, %v6125_v50  ;;  %vm1645_vm14 = vcmp.eq.f32.partialorder %v6183_v22, 0.0  ;;  %vm1638_vm15 = vcmp.eq.f32.partialorder %v6207_v34, 0.0 }
 0x280   : > { %v3169_v5 = vrot.slane %v3141_v63, %v6125_v50  ;;  %5301 = vrsqrt.f32 %v6328_v44  ;;  %v1647_v17 = vsel %vm1645_vm14, %v1646_v37, %v6284_v45  ;;  %v6352_v42 = vsel %vm1638_vm15, %v1639_v23, %v1637_v9 }
 0x281   : > { %v3333_v10 = vcombine.low %v3325_v4, %v3332_v13  ;;  %v3170_v36 = vcombine.low %v3148_v41, %v3155_v15  ;;  %v2079_v18 = vrot.slane %v1626_v38, %v6092_v52  ;;  %v2083_v19 = vrot.slane %v1626_v38, %v6095_v1 }
 0x282   : > { %v3171_v53 = vcombine.low %v3162_v16, %v3169_v5  ;;  %v2087_v20 = vrot.slane %v1626_v38, %v6098_v55  ;;  %v2091_v49 = vrot.slane %v1626_v38, %v6101_v11  ;;  %v2095_v22 = vrot.slane %v1626_v38, %v6104_v54 }
 0x283   : > { %4440 = vperm.xlu0 %5278, %v3333_v10   ;;  %v3178_v21 = vrot.slane %v3170_v36, %v6125_v50  ;;  %v2099_v34 = vrot.slane %v1626_v38, %v6107_v60  ;;  %v2103_v23 = vrot.slane %v1626_v38, %v6110_v6  ;;  %v2107_v45 = vrot.slane %v1626_v38, %v6113_v47 }
 0x284   : > { %v3185_v37 = vrot.slane %v3171_v53, %v6125_v50  ;;  %v3236_v24 = vcombine.low %v2079_v18, %v2083_v19  ;;  %vm1685_vm0 = vcmp.eq.f32.partialorder %v6316_v35, inf  ;;  %v3237_v25 = vcombine.low %v2087_v20, %v2091_v49 }
 0x285   : > { %v3238_v7 = vcombine.low %v2095_v22, %v2099_v34  ;;  %v2175_v56 = vrot.slane %v1647_v17, %v6092_v52  ;;  %v2179_v14 = vrot.slane %v1647_v17, %v6095_v1  ;;  %v3239_v26 = vcombine.low %v2103_v23, %v2107_v45 }
 0x286   : > { %v3186_v46 = vcombine.low %v3178_v21, %v3185_v37  ;;  %v3246_v27 = vrot.slane %v3236_v24, %v6125_v50  ;;  %v2183_v28 = vrot.slane %v1647_v17, %v6098_v55  ;;  %v5300_v57 = vpop.eup %5299  ;;  %v3253_v29 = vrot.slane %v3237_v25, %v6125_v50 }
 0x287   : > { %v3260_v30 = vrot.slane %v3238_v7, %v6125_v50  ;;  %v2187_v59 = vrot.slane %v1647_v17, %v6101_v11  ;;  %v2191_v31 = vrot.slane %v1647_v17, %v6104_v54  ;;  %v1688_v33 = vand.u32 2147483648, %v6316_v35 }
 0x288   : > { %4431 = vperm.xlu1 %5277, %v3186_v46   ;;  %v3267_v40 = vrot.slane %v3239_v26, %v6125_v50  ;;  %v2195_v0 = vrot.slane %v1647_v17, %v6107_v60  ;;  %v2199_v39 = vrot.slane %v1647_v17, %v6110_v6  ;;  %vm1687_vm1 = vcmp.eq.f32.partialorder %v6316_v35, 0.0 }
 0x289   : > { %v3268_v58 = vcombine.low %v3246_v27, %v3253_v29  ;;  %v2203_v32 = vrot.slane %v1647_v17, %v6113_v47  ;;  %v3383_v43 = vcombine.low %v2175_v56, %v2179_v14  ;;  %v3384_v61 = vcombine.low %v2183_v28, %v2187_v59 }
 0x28a   : > { %v5302_v48 = vpop.eup %5301  ;;  %v1684_v51 = vmul.f32 %v5300_v57, %v6316_v35  ;;  %vm1678_vm2 = vcmp.eq.f32.partialorder %v6328_v44, inf  ;;  %v3269_v12 = vcombine.low %v3260_v30, %v3267_v40  ;;  %v3385_v8 = vcombine.low %v2191_v31, %v2195_v0 }
 0x28b   : > { %v1681_v9 = vand.u32 2147483648, %v6328_v44  ;;  %v3276_v4 = vrot.slane %v3268_v58, %v6125_v50  ;;  %v3386_v63 = vcombine.low %v2199_v39, %v2203_v32  ;;  %v2143_v41 = vrot.slane %v6352_v42, %v6092_v52 }
 0x28c   : > { %v3283_v38 = vrot.slane %v3269_v12, %v6125_v50  ;;  %v3393_v13 = vrot.slane %v3383_v43, %v6125_v50  ;;  %v3400_v15 = vrot.slane %v3384_v61, %v6125_v50  ;;  %v3407_v16 = vrot.slane %v3385_v8, %v6125_v50 }
 0x28d   : > { %v1677_v5 = vmul.f32 %v5302_v48, %v6328_v44  ;;  %v3414_v17 = vrot.slane %v3386_v63, %v6125_v50  ;;  %v2147_v10 = vrot.slane %v6352_v42, %v6095_v1  ;;  %v2151_v36 = vrot.slane %v6352_v42, %v6098_v55 }
 0x28e   : > { %v1686_v53 = vsel %vm1685_vm0, %v6316_v35, %v1684_v51  ;;  %v3284_v18 = vcombine.low %v3276_v4, %v3283_v38  ;;  %v3415_v19 = vcombine.low %v3393_v13, %v3400_v15  ;;  %v2155_v20 = vrot.slane %v6352_v42, %v6101_v11 }
 0x28f   : > { %v3416_v21 = vcombine.low %v3407_v16, %v3414_v17  ;;  %v2159_v49 = vrot.slane %v6352_v42, %v6104_v54  ;;  %v2163_v22 = vrot.slane %v6352_v42, %v6107_v60  ;;  %v2167_v34 = vrot.slane %v6352_v42, %v6110_v6 }
 0x290   : > { %4437 = vperm.xlu1 %5277, %v3284_v18   ;;  %v3423_v37 = vrot.slane %v3415_v19, %v6125_v50  ;;  %v2171_v23 = vrot.slane %v6352_v42, %v6113_v47  ;;  %v3334_v45 = vcombine.low %v2143_v41, %v2147_v10  ;;  %v3335_v24 = vcombine.low %v2151_v36, %v2155_v20 }
 0x291   : > { %v6409_v25 = vpop.xlane.xlu0 %1538  ;;  %v1679_v7 = vsel %vm1678_vm2, %v6328_v44, %v1677_v5  ;;  %v3430_v56 = vrot.slane %v3416_v21, %v6125_v50  ;;  %v3336_v14 = vcombine.low %v2159_v49, %v2163_v22  ;;  %v1689_v26 = vsel %vm1687_vm1, %v1688_v33, %v1686_v53 }
 0x292   : > { %5303 = vrsqrt.f32 %v6409_v25  ;;  %v6416_v46 = vpop.xlane.xlu1 %1536  ;;  %v3337_v27 = vcombine.low %v2167_v34, %v2171_v23  ;;  %v3344_v42 = vrot.slane %v3334_v45, %v6125_v50  ;;  %v3351_v28 = vrot.slane %v3335_v24, %v6125_v50 }
 0x293   : > { %vm1680_vm3 = vcmp.eq.f32.partialorder %v6328_v44, 0.0  ;;  %v3431_v57 = vcombine.low %v3423_v37, %v3430_v56  ;;  %v3358_v29 = vrot.slane %v3336_v14, %v6125_v50  ;;  %5305 = vrsqrt.f32 %v6416_v46 }
 0x294   : > { %v1682_v30 = vsel %vm1680_vm3, %v1681_v9, %v1679_v7  ;;  %v3365_v59 = vrot.slane %v3337_v27, %v6125_v50  ;;  %v3366_v31 = vcombine.low %v3344_v42, %v3351_v28  ;;  %vm1699_vm4 = vcmp.eq.f32.partialorder %v6409_v25, inf }
 0x295   : > { %4446 = vperm.xlu1 %5277, %v3431_v57   ;;  %v1702_v35 = vand.u32 2147483648, %v6409_v25  ;;  %v2367_v33 = vrot.slane %v1689_v26, %v6092_v52  ;;  %v2371_v40 = vrot.slane %v1689_v26, %v6095_v1  ;;  %v2375_v44 = vrot.slane %v1689_v26, %v6098_v55 }
 0x296   : > { %v3367_v0 = vcombine.low %v3358_v29, %v3365_v59  ;;  %v3374_v39 = vrot.slane %v3366_v31, %v6125_v50  ;;  %v2379_v58 = vrot.slane %v1689_v26, %v6101_v11  ;;  %v2383_v32 = vrot.slane %v1689_v26, %v6104_v54  ;;  %v6446_v10 = vpop.xlane.xlu0 %1542 }
 0x297   : > { %vm1701_vm5 = vcmp.eq.f32.partialorder %v6409_v25, 0.0  ;;  %v2387_v43 = vrot.slane %v1689_v26, %v6107_v60  ;;  %v2391_v61 = vrot.slane %v1689_v26, %v6110_v6  ;;  %v2395_v48 = vrot.slane %v1689_v26, %v6113_v47  ;;  %v6464_v57 = vpop.xlane.xlu1 %1540 }
 0x298   : > { %v3677_v51 = vcombine.low %v2367_v33, %v2371_v40  ;;  %v3381_v12 = vrot.slane %v3367_v0, %v6125_v50  ;;  %v3678_v8 = vcombine.low %v2375_v44, %v2379_v58  ;;  %v2335_v9 = vrot.slane %v1682_v30, %v6092_v52 }
 0x299   : > { %v2339_v4 = vrot.slane %v1682_v30, %v6095_v1  ;;  %v3679_v63 = vcombine.low %v2383_v32, %v2387_v43  ;;  %v3680_v41 = vcombine.low %v2391_v61, %v2395_v48  ;;  %v2343_v13 = vrot.slane %v1682_v30, %v6098_v55 }
 0x29a   : > { %v3687_v38 = vrot.slane %v3677_v51, %v6125_v50  ;;  %v3382_v15 = vcombine.low %v3374_v39, %v3381_v12  ;;  %v3694_v16 = vrot.slane %v3678_v8, %v6125_v50  ;;  %v2347_v5 = vrot.slane %v1682_v30, %v6101_v11 }
 0x29b   : > { %v2351_v17 = vrot.slane %v1682_v30, %v6104_v54  ;;  %v3701_v53 = vrot.slane %v3679_v63, %v6125_v50  ;;  %v3708_v18 = vrot.slane %v3680_v41, %v6125_v50  ;;  %v2355_v19 = vrot.slane %v1682_v30, %v6107_v60 }
 0x29c   : > { %v5304_v36 = vpop.eup %5303  ;;  %v2359_v20 = vrot.slane %v1682_v30, %v6110_v6  ;;  %4443 = vperm.xlu1 %5277, %v3382_v15   ;;  %v3709_v49 = vcombine.low %v3687_v38, %v3694_v16  ;;  %v2363_v22 = vrot.slane %v1682_v30, %v6113_v47  ;;  %v3628_v34 = vcombine.low %v2335_v9, %v2339_v4 }
 0x29d   : > { %v1698_v21 = vmul.f32 %v5304_v36, %v6409_v25  ;;  %v5306_v37 = vpop.eup %5305  ;;  %v3710_v23 = vcombine.low %v3701_v53, %v3708_v18  ;;  %v3629_v45 = vcombine.low %v2343_v13, %v2347_v5  ;;  %v3630_v24 = vcombine.low %v2351_v17, %v2355_v19 }
 0x29e   : > { %5307 = vrsqrt.f32 %v6446_v10  ;;  %v1691_v56 = vmul.f32 %v5306_v37, %v6416_v46  ;;  %v3717_v14 = vrot.slane %v3709_v49, %v6125_v50  ;;  %v3631_v26 = vcombine.low %v2359_v20, %v2363_v22 }
 0x29f   : > { %v1700_v7 = vsel %vm1699_vm4, %v6409_v25, %v1698_v21  ;;  %vm1692_vm6 = vcmp.eq.f32.partialorder %v6416_v46, inf  ;;  %v3724_v27 = vrot.slane %v3710_v23, %v6125_v50  ;;  %v3638_v42 = vrot.slane %v3628_v34, %v6125_v50 }
 0x2a0   : > { %v3645_v28 = vrot.slane %v3629_v45, %v6125_v50  ;;  %v1703_v29 = vsel %vm1701_vm5, %v1702_v35, %v1700_v7  ;;  %v1693_v30 = vsel %vm1692_vm6, %v6416_v46, %v1691_v56  ;;  %v3652_v59 = vrot.slane %v3630_v24, %v6125_v50 }
 0x2a1   : > { %v3659_v31 = vrot.slane %v3631_v26, %v6125_v50  ;;  %v1695_v33 = vand.u32 2147483648, %v6416_v46  ;;  %v3725_v40 = vcombine.low %v3717_v14, %v3724_v27  ;;  %vm1694_vm7 = vcmp.eq.f32.partialorder %v6416_v46, 0.0 }
 0x2a2   : > { %v3660_v44 = vcombine.low %v3638_v42, %v3645_v28  ;;  %5309 = vrsqrt.f32 %v6464_v57  ;;  %v2431_v35 = vrot.slane %v1703_v29, %v6092_v52  ;;  %v2435_v32 = vrot.slane %v1703_v29, %v6095_v1 }
 0x2a3   : > { %v3661_v0 = vcombine.low %v3652_v59, %v3659_v31  ;;  %v1696_v39 = vsel %vm1694_vm7, %v1695_v33, %v1693_v30  ;;  %4464 = vperm.xlu0 %5278, %v3725_v40   ;;  %v2439_v43 = vrot.slane %v1703_v29, %v6098_v55  ;;  %v2443_v61 = vrot.slane %v1703_v29, %v6101_v11 }
 0x2a4   : > { %v3668_v25 = vrot.slane %v3660_v44, %v6125_v50  ;;  %v2447_v48 = vrot.slane %v1703_v29, %v6104_v54  ;;  %v2451_v46 = vrot.slane %v1703_v29, %v6107_v60  ;;  %v2455_v51 = vrot.slane %v1703_v29, %v6110_v6 }
 0x2a5   : > { %v3675_v58 = vrot.slane %v3661_v0, %v6125_v50  ;;  %v2459_v12 = vrot.slane %v1703_v29, %v6113_v47  ;;  %vm1713_vm8 = vcmp.eq.f32.partialorder %v6446_v10, inf  ;;  %v3775_v9 = vcombine.low %v2431_v35, %v2435_v32 }
 0x2a6   : > { %v3776_v4 = vcombine.low %v2439_v43, %v2443_v61  ;;  %v1716_v41 = vand.u32 2147483648, %v6446_v10  ;;  %v3777_v38 = vcombine.low %v2447_v48, %v2451_v46  ;;  %v2399_v15 = vrot.slane %v1696_v39, %v6092_v52 }
 0x2a7   : > { %v3676_v8 = vcombine.low %v3668_v25, %v3675_v58  ;;  %v3778_v13 = vcombine.low %v2455_v51, %v2459_v12  ;;  %v3785_v5 = vrot.slane %v3775_v9, %v6125_v50  ;;  %v2403_v36 = vrot.slane %v1696_v39, %v6095_v1 }
 0x2a8   : > { %v5308_v63 = vpop.eup %5307  ;;  %v3792_v17 = vrot.slane %v3776_v4, %v6125_v50  ;;  %v3799_v18 = vrot.slane %v3777_v38, %v6125_v50  ;;  %v2407_v20 = vrot.slane %v1696_v39, %v6098_v55  ;;  %v2411_v21 = vrot.slane %v1696_v39, %v6101_v11 }
 0x2a9   : > { %4461 = vperm.xlu1 %5277, %v3676_v8   ;;  %v1712_v16 = vmul.f32 %v5308_v63, %v6446_v10  ;;  %v3806_v19 = vrot.slane %v3778_v13, %v6125_v50  ;;  %v2415_v34 = vrot.slane %v1696_v39, %v6104_v54  ;;  %v2419_v37 = vrot.slane %v1696_v39, %v6107_v60 }
 0x2aa   : > { %v6491_v53 = vpop.xlane.xlu0 %1546  ;;  %vm1715_vm9 = vcmp.eq.f32.partialorder %v6446_v10, 0.0  ;;  %vm1706_vm10 = vcmp.eq.f32.partialorder %v6464_v57, inf  ;;  %vm1708_vm12 = vcmp.eq.f32.partialorder %v6464_v57, 0.0  ;;  %v1709_v23 = vand.u32 2147483648, %v6464_v57 }
 0x2ab   : > { %v1714_v49 = vsel %vm1713_vm8, %v6446_v10, %v1712_v16  ;;  %5311 = vrsqrt.f32 %v6491_v53  ;;  %v6501_v22 = vpop.xlane.xlu1 %1544  ;;  %v3807_v7 = vcombine.low %v3785_v5, %v3792_v17  ;;  %v3808_v56 = vcombine.low %v3799_v18, %v3806_v19 }
 0x2ac   : > { %v5310_v45 = vpop.eup %5309  ;;  %v1717_v24 = vsel %vm1715_vm9, %v1716_v41, %v1714_v49  ;;  %5313 = vrsqrt.f32 %v6501_v22  ;;  %v2423_v26 = vrot.slane %v1696_v39, %v6110_v6  ;;  %v2427_v27 = vrot.slane %v1696_v39, %v6113_v47 }
 0x2ad   : > { %v1705_v14 = vmul.f32 %v5310_v45, %v6464_v57  ;;  %v3726_v42 = vcombine.low %v2399_v15, %v2403_v36  ;;  %vm1727_vm11 = vcmp.eq.f32.partialorder %v6491_v53, inf  ;;  %v3815_v10 = vrot.slane %v3807_v7, %v6125_v50 }
 0x2ae   : > { %v3822_v28 = vrot.slane %v3808_v56, %v6125_v50  ;;  %v3727_v29 = vcombine.low %v2407_v20, %v2411_v21  ;;  %v3728_v30 = vcombine.low %v2415_v34, %v2419_v37  ;;  %v3729_v31 = vcombine.low %v2423_v26, %v2427_v27 }
 0x2af   : > { %v1707_v59 = vsel %vm1706_vm10, %v6464_v57, %v1705_v14  ;;  %v3736_v33 = vrot.slane %v3726_v42, %v6125_v50  ;;  %v2495_v40 = vrot.slane %v1717_v24, %v6092_v52  ;;  %v2499_v58 = vrot.slane %v1717_v24, %v6095_v1 }
 0x2b0   : > { %v1710_v44 = vsel %vm1708_vm12, %v1709_v23, %v1707_v59  ;;  %v3823_v0 = vcombine.low %v3815_v10, %v3822_v28  ;;  %v3743_v39 = vrot.slane %v3727_v29, %v6125_v50  ;;  %v3750_v25 = vrot.slane %v3728_v30, %v6125_v50 }
 0x2b1   : > { %v3757_v35 = vrot.slane %v3729_v31, %v6125_v50  ;;  %v2503_v32 = vrot.slane %v1717_v24, %v6098_v55  ;;  %v2507_v43 = vrot.slane %v1717_v24, %v6101_v11  ;;  %v2511_v48 = vrot.slane %v1717_v24, %v6104_v54 }
 0x2b2   : > { %4470 = vperm.xlu0 %5278, %v3823_v0   ;;  %v3758_v61 = vcombine.low %v3736_v33, %v3743_v39  ;;  %v2515_v57 = vrot.slane %v1717_v24, %v6107_v60  ;;  %v2519_v46 = vrot.slane %v1717_v24, %v6110_v6  ;;  %v2523_v12 = vrot.slane %v1717_v24, %v6113_v47 }
 0x2b3   : > { %v3759_v51 = vcombine.low %v3750_v25, %v3757_v35  ;;  %v3873_v8 = vcombine.low %v2495_v40, %v2499_v58  ;;  %v3874_v9 = vcombine.low %v2503_v32, %v2507_v43  ;;  %v1730_v63 = vand.u32 2147483648, %v6491_v53 }
 0x2b4   : > { %v3766_v41 = vrot.slane %v3758_v61, %v6125_v50  ;;  %v3875_v38 = vcombine.low %v2511_v48, %v2515_v57  ;;  %v2463_v13 = vrot.slane %v1710_v44, %v6092_v52  ;;  %v3876_v5 = vcombine.low %v2519_v46, %v2523_v12 }
 0x2b5   : > { %v5312_v4 = vpop.eup %5311  ;;  %v3773_v16 = vrot.slane %v3759_v51, %v6125_v50  ;;  %v3883_v17 = vrot.slane %v3873_v8, %v6125_v50  ;;  %v3890_v18 = vrot.slane %v3874_v9, %v6125_v50  ;;  %v2467_v20 = vrot.slane %v1710_v44, %v6095_v1 }
 0x2b6   : > { %v1726_v15 = vmul.f32 %v5312_v4, %v6491_v53  ;;  %v5314_v36 = vpop.eup %5313  ;;  %v3897_v19 = vrot.slane %v3875_v38, %v6125_v50  ;;  %v2471_v21 = vrot.slane %v1710_v44, %v6098_v55  ;;  %v3904_v37 = vrot.slane %v3876_v5, %v6125_v50 }
 0x2b7   : > { %v3774_v34 = vcombine.low %v3766_v41, %v3773_v16  ;;  %v2475_v23 = vrot.slane %v1710_v44, %v6101_v11  ;;  %vm1729_vm13 = vcmp.eq.f32.partialorder %v6491_v53, 0.0  ;;  %v3905_v45 = vcombine.low %v3883_v17, %v3890_v18 }
 0x2b8   : > { %v1728_v49 = vsel %vm1727_vm11, %v6491_v53, %v1726_v15  ;;  %v2479_v24 = vrot.slane %v1710_v44, %v6104_v54  ;;  %v3906_v56 = vcombine.low %v3897_v19, %v3904_v37  ;;  %v2483_v14 = vrot.slane %v1710_v44, %v6107_v60 }
 0x2b9   : > { %v1731_v7 = vsel %vm1729_vm13, %v1730_v63, %v1728_v49  ;;  %4467 = vperm.xlu1 %5277, %v3774_v34   ;;  %v2487_v26 = vrot.slane %v1710_v44, %v6110_v6  ;;  %v3913_v27 = vrot.slane %v3905_v45, %v6125_v50  ;;  %v2491_v42 = vrot.slane %v1710_v44, %v6113_v47 }
 0x2ba   : > { %v3824_v10 = vcombine.low %v2463_v13, %v2467_v20  ;;  %v3825_v28 = vcombine.low %v2471_v21, %v2475_v23  ;;  %v3920_v29 = vrot.slane %v3906_v56, %v6125_v50  ;;  %v3826_v30 = vcombine.low %v2479_v24, %v2483_v14 }
 0x2bb   : > { %v1719_v53 = vmul.f32 %v5314_v36, %v6501_v22  ;;  %v3827_v59 = vcombine.low %v2487_v26, %v2491_v42  ;;  %v2559_v25 = vrot.slane %v1731_v7, %v6092_v52  ;;  %v2563_v44 = vrot.slane %v1731_v7, %v6095_v1 }
 0x2bc   : > { %v3834_v31 = vrot.slane %v3824_v10, %v6125_v50  ;;  %v3841_v33 = vrot.slane %v3825_v28, %v6125_v50  ;;  %v3921_v40 = vcombine.low %v3913_v27, %v3920_v29  ;;  %v3848_v0 = vrot.slane %v3826_v30, %v6125_v50 }
 0x2bd   : > { %vm1720_vm14 = vcmp.eq.f32.partialorder %v6501_v22, inf  ;;  %v3855_v35 = vrot.slane %v3827_v59, %v6125_v50  ;;  %v1723_v32 = vand.u32 2147483648, %v6501_v22  ;;  %v2567_v43 = vrot.slane %v1731_v7, %v6098_v55 }
 0x2be   : > { %v6559_v39 = vpop.xlane.xlu0 %1550  ;;  %v3856_v58 = vcombine.low %v3834_v31, %v3841_v33  ;;  %4476 = vperm.xlu0 %5278, %v3921_v40   ;;  %v2571_v61 = vrot.slane %v1731_v7, %v6101_v11  ;;  %v2575_v48 = vrot.slane %v1731_v7, %v6104_v54  ;;  %v1721_v57 = vsel %vm1720_vm14, %v6501_v22, %v1719_v53 }
 0x2bf   : > { %v3857_v46 = vcombine.low %v3848_v0, %v3855_v35  ;;  %5315 = vrsqrt.f32 %v6559_v39  ;;  %v2579_v12 = vrot.slane %v1731_v7, %v6107_v60  ;;  %v2583_v8 = vrot.slane %v1731_v7, %v6110_v6  ;;  %v6578_v17 = vpop.xlane.xlu1 %1548 }
 0x2c0   : > { %v3864_v51 = vrot.slane %v3856_v58, %v6125_v50  ;;  %v2587_v9 = vrot.slane %v1731_v7, %v6113_v47  ;;  %v3971_v4 = vcombine.low %v2559_v25, %v2563_v44  ;;  %vm1722_vm15 = vcmp.eq.f32.partialorder %v6501_v22, 0.0 }
 0x2c1   : > { %v3871_v63 = vrot.slane %v3857_v46, %v6125_v50  ;;  %v1724_v41 = vsel %vm1722_vm15, %v1723_v32, %v1721_v57  ;;  %v3972_v38 = vcombine.low %v2567_v43, %v2571_v61  ;;  %v3973_v13 = vcombine.low %v2575_v48, %v2579_v12 }
 0x2c2   : > { %v3974_v15 = vcombine.low %v2583_v8, %v2587_v9  ;;  %v3981_v5 = vrot.slane %v3971_v4, %v6125_v50  ;;  %v2527_v22 = vrot.slane %v1724_v41, %v6092_v52  ;;  %v2531_v20 = vrot.slane %v1724_v41, %v6095_v1  ;;  %v6585_v21 = vpop.xlane.xlu0 %1502 }
 0x2c3   : > { %v3872_v16 = vcombine.low %v3864_v51, %v3871_v63  ;;  %v3988_v36 = vrot.slane %v3972_v38, %v6125_v50  ;;  %v3995_v18 = vrot.slane %v3973_v13, %v6125_v50  ;;  %v2535_v37 = vrot.slane %v1724_v41, %v6098_v55 }
 0x2c4   : > { %v4002_v19 = vrot.slane %v3974_v15, %v6125_v50  ;;  %5317 = vrsqrt.f32 %v6578_v17  ;;  %v2539_v23 = vrot.slane %v1724_v41, %v6101_v11  ;;  %v2543_v45 = vrot.slane %v1724_v41, %v6104_v54 }
 0x2c5   : > { %4473 = vperm.xlu1 %5277, %v3872_v16   ;;  %v4003_v49 = vcombine.low %v3981_v5, %v3988_v36  ;;  %v2547_v56 = vrot.slane %v1724_v41, %v6107_v60  ;;  %v2551_v26 = vrot.slane %v1724_v41, %v6110_v6  ;;  %v2555_v27 = vrot.slane %v1724_v41, %v6113_v47 }
 0x2c6   : > { %v4004_v34 = vcombine.low %v3995_v18, %v4002_v19  ;;  %v3922_v42 = vcombine.low %v2527_v22, %v2531_v20  ;;  %5319 = vrsqrt.f32 %v6585_v21  ;;  %v3923_v28 = vcombine.low %v2535_v37, %v2539_v23  ;;  %v6599_v31 = vpop.xlane.xlu0 %1524 }
 0x2c7   : > { %v4011_v24 = vrot.slane %v4003_v49, %v6125_v50  ;;  %v3924_v29 = vcombine.low %v2543_v45, %v2547_v56  ;;  %v3925_v30 = vcombine.low %v2551_v26, %v2555_v27  ;;  %v6603_v0 = vpop.xlane.xlu1 %1554  ;;  %vm1741_vm0 = vcmp.eq.f32.partialorder %v6559_v39, inf }
 0x2c8   : > { %v4018_v7 = vrot.slane %v4004_v34, %v6125_v50  ;;  %v3932_v53 = vrot.slane %v3922_v42, %v6125_v50  ;;  %v3939_v33 = vrot.slane %v3923_v28, %v6125_v50  ;;  %5321 = vrsqrt.f32 %v6599_v31 }
 0x2c9   : > { %v5316_v14 = vpop.eup %5315  ;;  %v3946_v40 = vrot.slane %v3924_v29, %v6125_v50  ;;  %v3953_v25 = vrot.slane %v3925_v30, %v6125_v50  ;;  %5323 = vrsqrt.f32 %v6603_v0  ;;  %v1744_v61 = vand.u32 2147483648, %v6559_v39 }
 0x2ca   : > { %v4019_v10 = vcombine.low %v4011_v24, %v4018_v7  ;;  %v1740_v59 = vmul.f32 %v5316_v14, %v6559_v39  ;;  %v3954_v44 = vcombine.low %v3932_v53, %v3939_v33  ;;  %vm1743_vm1 = vcmp.eq.f32.partialorder %v6559_v39, 0.0  ;;  %v6621_v4 = vpop.xlane.xlu0 %1526 }
 0x2cb   : > { %v3955_v35 = vcombine.low %v3946_v40, %v3953_v25  ;;  %vm1734_vm2 = vcmp.eq.f32.partialorder %v6578_v17, inf  ;;  %vm1736_vm3 = vcmp.eq.f32.partialorder %v6578_v17, 0.0  ;;  %v6617_v8 = vpop.xlane.xlu1 %1552  ;;  %v1737_v9 = vand.u32 2147483648, %v6578_v17 }
 0x2cc   : > { %4482 = vperm.xlu0 %5278, %v4019_v10   ;;  %v1742_v58 = vsel %vm1741_vm0, %v6559_v39, %v1740_v59  ;;  %v3962_v32 = vrot.slane %v3954_v44, %v6125_v50  ;;  %vm1573_vm4 = vcmp.eq.f32.partialorder %v6585_v21, inf  ;;  %vm1575_vm5 = vcmp.eq.f32.partialorder %v6585_v21, 0.0 }
 0x2cd   : > { %v3969_v48 = vrot.slane %v3955_v35, %v6125_v50  ;;  %v1745_v57 = vsel %vm1743_vm1, %v1744_v61, %v1742_v58  ;;  %v1576_v38 = vand.u32 2147483648, %v6585_v21  ;;  %vm1650_vm6 = vcmp.eq.f32.partialorder %v6599_v31, inf }
 0x2ce   : > { %v5318_v43 = vpop.eup %5317  ;;  %v2623_v39 = vrot.slane %v1745_v57, %v6092_v52  ;;  %v2627_v63 = vrot.slane %v1745_v57, %v6095_v1  ;;  %v2631_v15 = vrot.slane %v1745_v57, %v6098_v55  ;;  %v2635_v16 = vrot.slane %v1745_v57, %v6101_v11  ;;  %v6650_v26 = vpop.xlane.xlu0 %1528 }
 0x2cf   : > { %v3970_v46 = vcombine.low %v3962_v32, %v3969_v48  ;;  %v1733_v12 = vmul.f32 %v5318_v43, %v6578_v17  ;;  %v2639_v5 = vrot.slane %v1745_v57, %v6104_v54  ;;  %5325 = vrsqrt.f32 %v6617_v8 }
 0x2d0   : > { %v5320_v51 = vpop.eup %5319  ;;  %v2643_v18 = vrot.slane %v1745_v57, %v6107_v60  ;;  %v2647_v19 = vrot.slane %v1745_v57, %v6110_v6  ;;  %v2651_v22 = vrot.slane %v1745_v57, %v6113_v47  ;;  %vm1652_vm7 = vcmp.eq.f32.partialorder %v6599_v31, 0.0  ;;  %v6647_v7 = vpop.xlane.xlu1 %1556 }
 0x2d1   : > { %4479 = vperm.xlu1 %5277, %v3970_v46   ;;  %v1572_v41 = vmul.f32 %v5320_v51, %v6585_v21  ;;  %v1735_v13 = vsel %vm1734_vm2, %v6578_v17, %v1733_v12  ;;  %v1653_v49 = vand.u32 2147483648, %v6599_v31  ;;  %vm1755_vm8 = vcmp.eq.f32.partialorder %v6603_v0, inf }
 0x2d2   : > { %v5322_v36 = vpop.eup %5321  ;;  %v4069_v34 = vcombine.low %v2623_v39, %v2627_v63  ;;  %v4070_v37 = vcombine.low %v2631_v15, %v2635_v16  ;;  %v1738_v23 = vsel %vm1736_vm3, %v1737_v9, %v1735_v13  ;;  %vm1757_vm9 = vcmp.eq.f32.partialorder %v6603_v0, 0.0  ;;  %v6684_v9 = vpop.xlane.xlu0 %1530 }
 0x2d3   : > { %v5324_v20 = vpop.eup %5323  ;;  %v1574_v45 = vsel %vm1573_vm4, %v6585_v21, %v1572_v41  ;;  %v1758_v24 = vand.u32 2147483648, %v6603_v0  ;;  %v4071_v56 = vcombine.low %v2639_v5, %v2643_v18  ;;  %v1649_v14 = vmul.f32 %v5322_v36, %v6599_v31 }
 0x2d4   : > { %v4072_v27 = vcombine.low %v2647_v19, %v2651_v22  ;;  %v4079_v42 = vrot.slane %v4069_v34, %v6125_v50  ;;  %v4086_v17 = vrot.slane %v4070_v37, %v6125_v50  ;;  %v1754_v10 = vmul.f32 %v5324_v20, %v6603_v0  ;;  %v6676_v61 = vpop.xlane.xlu1 %1558 }
 0x2d5   : > { %5327 = vrsqrt.f32 %v6621_v4  ;;  %v1660_v28 = vand.u32 2147483648, %v6621_v4  ;;  %v4093_v29 = vrot.slane %v4071_v56, %v6125_v50  ;;  %v6660_v30 = vsel %vm1575_vm5, %v1576_v38, %v1574_v45 }
 0x2d6   : > { %v4100_v53 = vrot.slane %v4072_v27, %v6125_v50  ;;  %v4101_v59 = vcombine.low %v4079_v42, %v4086_v17  ;;  %v2591_v33 = vrot.slane %v1738_v23, %v6092_v52  ;;  %v2595_v40 = vrot.slane %v1738_v23, %v6095_v1 }
 0x2d7   : > { %v2599_v25 = vrot.slane %v1738_v23, %v6098_v55  ;;  %v2603_v44 = vrot.slane %v1738_v23, %v6101_v11  ;;  %v2607_v35 = vrot.slane %v1738_v23, %v6104_v54  ;;  %v1651_v58 = vsel %vm1650_vm6, %v6599_v31, %v1649_v14 }
 0x2d8   : > { %5329 = vrsqrt.f32 %v6650_v26  ;;  %v4102_v21 = vcombine.low %v4093_v29, %v4100_v53  ;;  %v4109_v32 = vrot.slane %v4101_v59, %v6125_v50  ;;  %v1756_v43 = vsel %vm1755_vm8, %v6603_v0, %v1754_v10  ;;  %v6706_v37 = vpop.xlane.xlu1 %1500 }
 0x2d9   : > { %v2611_v48 = vrot.slane %v1738_v23, %v6107_v60  ;;  %v2615_v57 = vrot.slane %v1738_v23, %v6110_v6  ;;  %v2619_v46 = vrot.slane %v1738_v23, %v6113_v47  ;;  %v1751_v51 = vand.u32 2147483648, %v6617_v8  ;;  %v5326_v63 = vpop.eup %5325 }
 0x2da   : > { %v1667_v12 = vand.u32 2147483648, %v6650_v26  ;;  %5331 = vrsqrt.f32 %v6647_v7  ;;  %v4116_v39 = vrot.slane %v4102_v21, %v6125_v50  ;;  %v6689_v41 = vsel %vm1652_vm7, %v1653_v49, %v1651_v58 }
 0x2db   : > { %vm1748_vm10 = vcmp.eq.f32.partialorder %v6617_v8, inf  ;;  %v4020_v38 = vcombine.low %v2591_v33, %v2595_v40  ;;  %v4021_v13 = vcombine.low %v2599_v25, %v2603_v44  ;;  %v4022_v15 = vcombine.low %v2607_v35, %v2611_v48 }
 0x2dc   : > { %v6694_v16 = vsel %vm1757_vm9, %v1758_v24, %v1756_v43  ;;  %v1765_v5 = vand.u32 2147483648, %v6647_v7  ;;  %v4117_v36 = vcombine.low %v4109_v32, %v4116_v39  ;;  %v4023_v18 = vcombine.low %v2615_v57, %v2619_v46 }
 0x2dd   : > { %5333 = vrsqrt.f32 %v6684_v9  ;;  %v4030_v19 = vrot.slane %v4020_v38, %v6125_v50  ;;  %v4037_v31 = vrot.slane %v4021_v13, %v6125_v50  ;;  %v4044_v22 = vrot.slane %v4022_v15, %v6125_v50 }
 0x2de   : > { %vm1657_vm12 = vcmp.eq.f32.partialorder %v6621_v4, inf  ;;  %v1747_v20 = vmul.f32 %v5326_v63, %v6617_v8  ;;  %v1674_v0 = vand.u32 2147483648, %v6684_v9  ;;  %5335 = vrsqrt.f32 %v6676_v61  ;;  %4488 = vperm.xlu0 %5278, %v4117_v36  }
 0x2df   : > { %v4051_v49 = vrot.slane %v4023_v18, %v6125_v50  ;;  %v5328_v34 = vpop.eup %5327  ;;  %v4052_v23 = vcombine.low %v4030_v19, %v4037_v31  ;;  %v1855_v45 = vrot.slane %v6660_v30, %v6092_v52  ;;  %v1859_v24 = vrot.slane %v6660_v30, %v6095_v1 }
 0x2e0   : > { %v1863_v56 = vrot.slane %v6660_v30, %v6098_v55  ;;  %vm1750_vm11 = vcmp.eq.f32.partialorder %v6617_v8, 0.0  ;;  %v1867_v27 = vrot.slane %v6660_v30, %v6101_v11  ;;  %v1871_v42 = vrot.slane %v6660_v30, %v6104_v54 }
 0x2e1   : > { %v4053_v14 = vcombine.low %v4044_v22, %v4051_v49  ;;  %v1875_v17 = vrot.slane %v6660_v30, %v6107_v60  ;;  %v4060_v10 = vrot.slane %v4052_v23, %v6125_v50  ;;  %v1879_v29 = vrot.slane %v6660_v30, %v6110_v6 }
 0x2e2   : > { %v1883_v53 = vrot.slane %v6660_v30, %v6113_v47  ;;  %v2893_v59 = vcombine.low %v1855_v45, %v1859_v24  ;;  %v5330_v33 = vpop.eup %5329  ;;  %5337 = vrsqrt.f32 %v6706_v37  ;;  %v2894_v25 = vcombine.low %v1863_v56, %v1867_v27 }
 0x2e3   : > { %v4067_v40 = vrot.slane %v4053_v14, %v6125_v50  ;;  %v2895_v44 = vcombine.low %v1871_v42, %v1875_v17  ;;  %v1656_v35 = vmul.f32 %v5328_v34, %v6621_v4  ;;  %v1569_v58 = vand.u32 2147483648, %v6706_v37 }
 0x2e4   : > { %v2896_v21 = vcombine.low %v1879_v29, %v1883_v53  ;;  %v2903_v32 = vrot.slane %v2893_v59, %v6125_v50  ;;  %v5332_v43 = vpop.eup %5331  ;;  %v1749_v30 = vsel %vm1748_vm10, %v6617_v8, %v1747_v20  ;;  %vm1664_vm13 = vcmp.eq.f32.partialorder %v6650_v26, inf }
 0x2e5   : > { %v4068_v48 = vcombine.low %v4060_v10, %v4067_v40  ;;  %v2910_v57 = vrot.slane %v2894_v25, %v6125_v50  ;;  %v2917_v46 = vrot.slane %v2895_v44, %v6125_v50  ;;  %v2687_v63 = vrot.slane %v6694_v16, %v6092_v52 }
 0x2e6   : > { %v2924_v39 = vrot.slane %v2896_v21, %v6125_v50  ;;  %v2691_v38 = vrot.slane %v6694_v16, %v6095_v1  ;;  %v2695_v13 = vrot.slane %v6694_v16, %v6098_v55  ;;  %vm1659_vm14 = vcmp.eq.f32.partialorder %v6621_v4, 0.0 }
 0x2e7   : > { %4485 = vperm.xlu1 %5277, %v4068_v48   ;;  %v2925_v15 = vcombine.low %v2903_v32, %v2910_v57  ;;  %v2699_v36 = vrot.slane %v6694_v16, %v6101_v11  ;;  %v2703_v18 = vrot.slane %v6694_v16, %v6104_v54  ;;  %v2707_v19 = vrot.slane %v6694_v16, %v6107_v60  ;;  %v5334_v31 = vpop.eup %5333 }
 0x2e8   : > { %v1658_v22 = vsel %vm1657_vm12, %v6621_v4, %v1656_v35  ;;  %v2926_v20 = vcombine.low %v2917_v46, %v2924_v39  ;;  %v2711_v49 = vrot.slane %v6694_v16, %v6110_v6  ;;  %v2715_v34 = vrot.slane %v6694_v16, %v6113_v47  ;;  %v6758_v23 = vpop.eup %5335 }
 0x2e9   : > { %vm1666_vm15 = vcmp.eq.f32.partialorder %v6650_v26, 0.0  ;;  %v2933_v45 = vrot.slane %v2925_v15, %v6125_v50  ;;  %v4167_v24 = vcombine.low %v2687_v63, %v2691_v38  ;;  %v4168_v56 = vcombine.low %v2695_v13, %v2699_v36 }
 0x2ea   : > { %v4169_v14 = vcombine.low %v2703_v18, %v2707_v19  ;;  %v1752_v27 = vsel %vm1750_vm11, %v1751_v51, %v1749_v30  ;;  %v1663_v42 = vmul.f32 %v5330_v33, %v6650_v26  ;;  %v2940_v17 = vrot.slane %v2926_v20, %v6125_v50 }
 0x2eb   : > { %v4170_v10 = vcombine.low %v2711_v49, %v2715_v34  ;;  %vm1671_vm0 = vcmp.eq.f32.partialorder %v6684_v9, inf  ;;  %v4177_v16 = vrot.slane %v4167_v24, %v6125_v50  ;;  %v4184_v29 = vrot.slane %v4168_v56, %v6125_v50 }
 0x2ec   : > { %v4191_v53 = vrot.slane %v4169_v14, %v6125_v50  ;;  %v2207_v59 = vrot.slane %v6689_v41, %v6092_v52  ;;  %v2941_v40 = vcombine.low %v2933_v45, %v2940_v17  ;;  %v2211_v51 = vrot.slane %v6689_v41, %v6095_v1  ;;  %v6779_v25 = vpop.eup %5337 }
 0x2ed   : > { %v4198_v8 = vrot.slane %v4170_v10, %v6125_v50  ;;  %v2215_v33 = vrot.slane %v6689_v41, %v6098_v55  ;;  %v4199_v44 = vcombine.low %v4177_v16, %v4184_v29  ;;  %v2219_v35 = vrot.slane %v6689_v41, %v6101_v11 }
 0x2ee   : > { %v2223_v21 = vrot.slane %v6689_v41, %v6104_v54  ;;  %v2227_v32 = vrot.slane %v6689_v41, %v6107_v60  ;;  %v1665_v30 = vsel %vm1664_vm13, %v6650_v26, %v1663_v42  ;;  %4416 = vperm.xlu1 %5277, %v2941_v40   ;;  %v2231_v57 = vrot.slane %v6689_v41, %v6110_v6 }
 0x2ef   : > { %v4200_v48 = vcombine.low %v4191_v53, %v4198_v8  ;;  %v2235_v46 = vrot.slane %v6689_v41, %v6113_v47  ;;  %v4207_v39 = vrot.slane %v4199_v44, %v6125_v50  ;;  %v3432_v63 = vcombine.low %v2207_v59, %v2211_v51 }
 0x2f0   : > { %v3433_v38 = vcombine.low %v2215_v33, %v2219_v35  ;;  %v3434_v13 = vcombine.low %v2223_v21, %v2227_v32  ;;  %v1661_v15 = vsel %vm1659_vm14, %v1660_v28, %v1658_v22  ;;  %v1670_v36 = vmul.f32 %v5334_v31, %v6684_v9 }
 0x2f1   : > { %v4214_v18 = vrot.slane %v4200_v48, %v6125_v50  ;;  %v3435_v19 = vcombine.low %v2231_v57, %v2235_v46  ;;  %v6802_v20 = vmul.f32 %v5332_v43, %v6647_v7  ;;  %v3442_v41 = vrot.slane %v3432_v63, %v6125_v50 }
 0x2f2   : > { %v3449_v49 = vrot.slane %v3433_v38, %v6125_v50  ;;  %v3456_v34 = vrot.slane %v3434_v13, %v6125_v50  ;;  %v6811_v4 = vsel %vm1666_vm15, %v1667_v12, %v1665_v30  ;;  %vm1673_vm1 = vcmp.eq.f32.partialorder %v6684_v9, 0.0 }
 0x2f3   : > { %v4215_v28 = vcombine.low %v4207_v39, %v4214_v18  ;;  %v3463_v31 = vrot.slane %v3435_v19, %v6125_v50  ;;  %v2655_v43 = vrot.slane %v1752_v27, %v6092_v52  ;;  %v2659_v45 = vrot.slane %v1752_v27, %v6095_v1 }
 0x2f4   : > { %v3464_v22 = vcombine.low %v3442_v41, %v3449_v49  ;;  %v2663_v24 = vrot.slane %v1752_v27, %v6098_v55  ;;  %v2667_v56 = vrot.slane %v1752_v27, %v6101_v11  ;;  %v1672_v26 = vsel %vm1671_vm0, %v6684_v9, %v1670_v36 }
 0x2f5   : > { %4494 = vperm.xlu0 %5278, %v4215_v28   ;;  %v3465_v12 = vcombine.low %v3456_v34, %v3463_v31  ;;  %v2671_v14 = vrot.slane %v1752_v27, %v6104_v54  ;;  %v2675_v42 = vrot.slane %v1752_v27, %v6107_v60  ;;  %v2679_v10 = vrot.slane %v1752_v27, %v6110_v6 }
 0x2f6   : > { %v3472_v17 = vrot.slane %v3464_v22, %v6125_v50  ;;  %v2683_v16 = vrot.slane %v1752_v27, %v6113_v47  ;;  %v4118_v29 = vcombine.low %v2655_v43, %v2659_v45  ;;  %vm1566_vm2 = vcmp.eq.f32.partialorder %v6706_v37, inf  ;;  %v6860_v22 = vpop.xlane.xlu1 %1560 }
 0x2f7   : > { %v3479_v53 = vrot.slane %v3465_v12, %v6125_v50  ;;  %v4119_v59 = vcombine.low %v2663_v24, %v2667_v56  ;;  %v4120_v40 = vcombine.low %v2671_v14, %v2675_v42  ;;  %v2239_v8 = vrot.slane %v1661_v15, %v6092_v52 }
 0x2f8   : > { %v4121_v51 = vcombine.low %v2679_v10, %v2683_v16  ;;  %v4128_v33 = vrot.slane %v4118_v29, %v6125_v50  ;;  %v2243_v44 = vrot.slane %v1661_v15, %v6095_v1  ;;  %v2247_v35 = vrot.slane %v1661_v15, %v6098_v55 }
 0x2f9   : > { %v3480_v21 = vcombine.low %v3472_v17, %v3479_v53  ;;  %v4135_v32 = vrot.slane %v4119_v59, %v6125_v50  ;;  %v4142_v27 = vrot.slane %v4120_v40, %v6125_v50  ;;  %v2251_v30 = vrot.slane %v1661_v15, %v6101_v11 }
 0x2fa   : > { %v4149_v48 = vrot.slane %v4121_v51, %v6125_v50  ;;  %v2255_v57 = vrot.slane %v1661_v15, %v6104_v54  ;;  %v2259_v46 = vrot.slane %v1661_v15, %v6107_v60  ;;  %v2263_v39 = vrot.slane %v1661_v15, %v6110_v6 }
 0x2fb   : > { %4449 = vperm.xlu1 %5277, %v3480_v21   ;;  %v4150_v63 = vcombine.low %v4128_v33, %v4135_v32  ;;  %v2267_v38 = vrot.slane %v1661_v15, %v6113_v47  ;;  %v3481_v13 = vcombine.low %v2239_v8, %v2243_v44  ;;  %v3482_v36 = vcombine.low %v2247_v35, %v2251_v30 }
 0x2fc   : > { %v6845_v18 = vsel %vm1673_vm1, %v1674_v0, %v1672_v26  ;;  %v1565_v19 = vmul.f32 %v6779_v25, %v6706_v37  ;;  %v4151_v41 = vcombine.low %v4142_v27, %v4149_v48  ;;  %v3483_v49 = vcombine.low %v2255_v57, %v2259_v46 }
 0x2fd   : > { %vm1568_vm3 = vcmp.eq.f32.partialorder %v6706_v37, 0.0  ;;  %v4158_v34 = vrot.slane %v4150_v63, %v6125_v50  ;;  %v3484_v28 = vcombine.low %v2263_v39, %v2267_v38  ;;  %v3491_v15 = vrot.slane %v3481_v13, %v6125_v50  ;;  %v6902_v39 = vpop.xlane.xlu1 %1562 }
 0x2fe   : > { %v3498_v31 = vrot.slane %v3482_v36, %v6125_v50  ;;  %v4165_v43 = vrot.slane %v4151_v41, %v6125_v50  ;;  %v3505_v9 = vrot.slane %v3483_v49, %v6125_v50  ;;  %v2271_v0 = vrot.slane %v6811_v4, %v6092_v52 }
 0x2ff   : > { %v2275_v25 = vrot.slane %v6811_v4, %v6095_v1  ;;  %vm1762_vm4 = vcmp.eq.f32.partialorder %v6647_v7, inf  ;;  %v3512_v45 = vrot.slane %v3484_v28, %v6125_v50  ;;  %v2279_v56 = vrot.slane %v6811_v4, %v6098_v55 }
 0x300   : > { %v3513_v24 = vcombine.low %v3491_v15, %v3498_v31  ;;  %v2283_v26 = vrot.slane %v6811_v4, %v6101_v11  ;;  %v1567_v12 = vsel %vm1566_vm2, %v6706_v37, %v1565_v19  ;;  %v4166_v14 = vcombine.low %v4158_v34, %v4165_v43 }
 0x301   : > { %v2287_v42 = vrot.slane %v6811_v4, %v6104_v54  ;;  %v2291_v17 = vrot.slane %v6811_v4, %v6107_v60  ;;  %vm1769_vm5 = vcmp.eq.f32.partialorder %v6676_v61, inf  ;;  %v3514_v10 = vcombine.low %v3505_v9, %v3512_v45 }
 0x302   : > { %v3521_v16 = vrot.slane %v3513_v24, %v6125_v50  ;;  %v2295_v29 = vrot.slane %v6811_v4, %v6110_v6  ;;  %v2299_v53 = vrot.slane %v6811_v4, %v6113_v47  ;;  %5339 = vrsqrt.f32 %v6860_v22  ;;  %4491 = vperm.xlu0 %5278, %v4166_v14  }
 0x303   : > { %v3530_v59 = vcombine.low %v2271_v0, %v2275_v25  ;;  %v3531_v40 = vcombine.low %v2279_v56, %v2283_v26  ;;  %v3532_v8 = vcombine.low %v2287_v42, %v2291_v17  ;;  %vm1764_vm6 = vcmp.eq.f32.partialorder %v6647_v7, 0.0 }
 0x304   : > { %v3528_v51 = vrot.slane %v3514_v10, %v6125_v50  ;;  %v3533_v33 = vcombine.low %v2295_v29, %v2299_v53  ;;  %v2303_v44 = vrot.slane %v6845_v18, %v6092_v52  ;;  %v2307_v35 = vrot.slane %v6845_v18, %v6095_v1 }
 0x305   : > { %v1768_v4 = vmul.f32 %v6758_v23, %v6676_v61  ;;  %vm1771_vm7 = vcmp.eq.f32.partialorder %v6676_v61, 0.0  ;;  %v3540_v21 = vrot.slane %v3530_v59, %v6125_v50  ;;  %v3547_v32 = vrot.slane %v3531_v40, %v6125_v50 }
 0x306   : > { %v3554_v27 = vrot.slane %v3532_v8, %v6125_v50  ;;  %v3529_v30 = vcombine.low %v3521_v16, %v3528_v51  ;;  %v3561_v48 = vrot.slane %v3533_v33, %v6125_v50  ;;  %v2311_v57 = vrot.slane %v6845_v18, %v6098_v55 }
 0x307   : > { %v2315_v46 = vrot.slane %v6845_v18, %v6101_v11  ;;  %v1570_v23 = vsel %vm1568_vm3, %v1569_v58, %v1567_v12  ;;  %v3562_v63 = vcombine.low %v3540_v21, %v3547_v32  ;;  %v2319_v38 = vrot.slane %v6845_v18, %v6104_v54 }
 0x308   : > { %v2323_v13 = vrot.slane %v6845_v18, %v6107_v60  ;;  %4452 = vperm.xlu1 %5277, %v3529_v30   ;;  %v3563_v36 = vcombine.low %v3554_v27, %v3561_v48  ;;  %v2327_v19 = vrot.slane %v6845_v18, %v6110_v6  ;;  %v2331_v41 = vrot.slane %v6845_v18, %v6113_v47 }
 0x309   : > { %v3579_v49 = vcombine.low %v2303_v44, %v2307_v35  ;;  %v1763_v37 = vsel %vm1762_vm4, %v6647_v7, %v6802_v20  ;;  %v3570_v58 = vrot.slane %v3562_v63, %v6125_v50  ;;  %v3580_v34 = vcombine.low %v2311_v57, %v2315_v46 }
 0x30a   : > { %v3581_v28 = vcombine.low %v2319_v38, %v2323_v13  ;;  %5341 = vrsqrt.f32 %v6902_v39  ;;  %v3577_v15 = vrot.slane %v3563_v36, %v6125_v50  ;;  %v3582_v31 = vcombine.low %v2327_v19, %v2331_v41 }
 0x30b   : > { %v3589_v43 = vrot.slane %v3579_v49, %v6125_v50  ;;  %v1770_v18 = vsel %vm1769_vm5, %v6676_v61, %v1768_v4  ;;  %v3596_v9 = vrot.slane %v3580_v34, %v6125_v50  ;;  %v1823_v20 = vrot.slane %v1570_v23, %v6092_v52 }
 0x30c   : > { %v3603_v0 = vrot.slane %v3581_v28, %v6125_v50  ;;  %v1772_v25 = vand.u32 2147483648, %v6676_v61  ;;  %v3578_v45 = vcombine.low %v3570_v58, %v3577_v15  ;;  %v3610_v24 = vrot.slane %v3582_v31, %v6125_v50  ;;  %v5340_v26 = vpop.eup %5339 }
 0x30d   : > { %v1827_v56 = vrot.slane %v1570_v23, %v6095_v1  ;;  %v1766_v12 = vsel %vm1764_vm6, %v1765_v5, %v1763_v37  ;;  %v3611_v14 = vcombine.low %v3589_v43, %v3596_v9  ;;  %v1831_v42 = vrot.slane %v1570_v23, %v6098_v55 }
 0x30e   : > { %v1835_v17 = vrot.slane %v1570_v23, %v6101_v11  ;;  %v6937_v10 = vsel %vm1771_vm7, %v1772_v25, %v1770_v18  ;;  %4455 = vperm.xlu1 %5277, %v3578_v45   ;;  %v3612_v16 = vcombine.low %v3603_v0, %v3610_v24  ;;  %v1839_v29 = vrot.slane %v1570_v23, %v6104_v54 }
 0x30f   : > { %v1843_v53 = vrot.slane %v1570_v23, %v6107_v60  ;;  %v3619_v59 = vrot.slane %v3611_v14, %v6125_v50  ;;  %v1847_v7 = vrot.slane %v1570_v23, %v6110_v6  ;;  %v1851_v5 = vrot.slane %v1570_v23, %v6113_v47 }
 0x310   : > { %v2844_v40 = vcombine.low %v1823_v20, %v1827_v56  ;;  %vm1776_vm8 = vcmp.eq.f32.partialorder %v6860_v22, inf  ;;  %v3626_v8 = vrot.slane %v3612_v16, %v6125_v50  ;;  %v2845_v61 = vcombine.low %v1831_v42, %v1835_v17 }
 0x311   : > { %v2846_v51 = vcombine.low %v1839_v29, %v1843_v53  ;;  %v1775_v33 = vmul.f32 %v5340_v26, %v6860_v22  ;;  %vm1778_vm9 = vcmp.eq.f32.partialorder %v6860_v22, 0.0  ;;  %v2847_v44 = vcombine.low %v1847_v7, %v1851_v5 }
 0x312   : > { %v2854_v35 = vrot.slane %v2844_v40, %v6125_v50  ;;  %v3627_v4 = vcombine.low %v3619_v59, %v3626_v8  ;;  %v2861_v21 = vrot.slane %v2845_v61, %v6125_v50  ;;  %v2719_v27 = vrot.slane %v1766_v12, %v6092_v52 }
 0x313   : > { %v2868_v32 = vrot.slane %v2846_v51, %v6125_v50  ;;  %v1779_v30 = vand.u32 2147483648, %v6860_v22  ;;  %v2875_v48 = vrot.slane %v2847_v44, %v6125_v50  ;;  %v2723_v57 = vrot.slane %v1766_v12, %v6095_v1 }
 0x314   : > { %v2727_v46 = vrot.slane %v1766_v12, %v6098_v55  ;;  %v5342_v23 = vpop.eup %5341  ;;  %vm1783_vm10 = vcmp.eq.f32.partialorder %v6902_v39, inf  ;;  %4458 = vperm.xlu1 %5277, %v3627_v4   ;;  %v2876_v63 = vcombine.low %v2854_v35, %v2861_v21  ;;  %v2731_v38 = vrot.slane %v1766_v12, %v6101_v11 }
 0x315   : > { %v2735_v13 = vrot.slane %v1766_v12, %v6104_v54  ;;  %v1777_v36 = vsel %vm1776_vm8, %v6860_v22, %v1775_v33  ;;  %v2877_v19 = vcombine.low %v2868_v32, %v2875_v48  ;;  %v2739_v41 = vrot.slane %v1766_v12, %v6107_v60 }
 0x316   : > { %v2743_v49 = vrot.slane %v1766_v12, %v6110_v6  ;;  %vm1785_vm12 = vcmp.eq.f32.partialorder %v6902_v39, 0.0  ;;  %v2884_v37 = vrot.slane %v2876_v63, %v6125_v50  ;;  %v2747_v58 = vrot.slane %v1766_v12, %v6113_v47 }
 0x317   : > { %v4216_v34 = vcombine.low %v2719_v27, %v2723_v57  ;;  %v4217_v28 = vcombine.low %v2727_v46, %v2731_v38  ;;  %v1782_v15 = vmul.f32 %v5342_v23, %v6902_v39  ;;  %v2891_v31 = vrot.slane %v2877_v19, %v6125_v50 }
 0x318   : > { %v4218_v43 = vcombine.low %v2735_v13, %v2739_v41  ;;  %v2751_v18 = vrot.slane %v6937_v10, %v6092_v52  ;;  %v4219_v9 = vcombine.low %v2743_v49, %v2747_v58  ;;  %v2755_v25 = vrot.slane %v6937_v10, %v6095_v1 }
 0x319   : > { %v4226_v0 = vrot.slane %v4216_v34, %v6125_v50  ;;  %v4233_v20 = vrot.slane %v4217_v28, %v6125_v50  ;;  %v1780_v45 = vsel %vm1778_vm9, %v1779_v30, %v1777_v36  ;;  %v2892_v24 = vcombine.low %v2884_v37, %v2891_v31 }
 0x31a   : > { %v4240_v56 = vrot.slane %v4218_v43, %v6125_v50  ;;  %v2759_v26 = vrot.slane %v6937_v10, %v6098_v55  ;;  %v4247_v12 = vrot.slane %v4219_v9, %v6125_v50  ;;  %v2763_v42 = vrot.slane %v6937_v10, %v6101_v11 }
 0x31b   : > { %v4248_v14 = vcombine.low %v4226_v0, %v4233_v20  ;;  %v2767_v17 = vrot.slane %v6937_v10, %v6104_v54  ;;  %v1784_v22 = vsel %vm1783_vm10, %v6902_v39, %v1782_v15  ;;  %4413 = vperm.xlu0 %5278, %v2892_v24   ;;  %v2771_v16 = vrot.slane %v6937_v10, %v6107_v60 }
 0x31c   : > { %v2775_v29 = vrot.slane %v6937_v10, %v6110_v6  ;;  %v2779_v53 = vrot.slane %v6937_v10, %v6113_v47  ;;  %v4249_v59 = vcombine.low %v4240_v56, %v4247_v12  ;;  %v4265_v5 = vcombine.low %v2751_v18, %v2755_v25 }
 0x31d   : > { %v4256_v7 = vrot.slane %v4248_v14, %v6125_v50  ;;  %v4266_v40 = vcombine.low %v2759_v26, %v2763_v42  ;;  %v1786_v8 = vand.u32 2147483648, %v6902_v39  ;;  %v4267_v61 = vcombine.low %v2767_v17, %v2771_v16 }
 0x31e   : > { %v4268_v51 = vcombine.low %v2775_v29, %v2779_v53  ;;  %v2783_v33 = vrot.slane %v1780_v45, %v6092_v52  ;;  %v4263_v44 = vrot.slane %v4249_v59, %v6125_v50  ;;  %v4275_v35 = vrot.slane %v4265_v5, %v6125_v50 }
 0x31f   : > { %v4282_v4 = vrot.slane %v4266_v40, %v6125_v50  ;;  %v2787_v21 = vrot.slane %v1780_v45, %v6095_v1  ;;  %v1787_v10 = vsel %vm1785_vm12, %v1786_v8, %v1784_v22  ;;  %v4289_v32 = vrot.slane %v4267_v61, %v6125_v50 }
 0x320   : > { %v4296_v27 = vrot.slane %v4268_v51, %v6125_v50  ;;  %v2791_v30 = vrot.slane %v1780_v45, %v6098_v55  ;;  %v4264_v48 = vcombine.low %v4256_v7, %v4263_v44  ;;  %v2795_v46 = vrot.slane %v1780_v45, %v6101_v11  ;;  %v7033_v7 = vpop.permute.xlu1 %4422  ;;  %v7047_v44 = vpop.permute.xlu0 %4440 }
 0x321   : > { %v4297_v57 = vcombine.low %v4275_v35, %v4282_v4  ;;  %v2799_v23 = vrot.slane %v1780_v45, %v6104_v54  ;;  %v2803_v38 = vrot.slane %v1780_v45, %v6107_v60  ;;  %v2807_v13 = vrot.slane %v1780_v45, %v6110_v6 }
 0x322   : > { %v4298_v63 = vcombine.low %v4289_v32, %v4296_v27  ;;  %4497 = vperm.xlu0 %5278, %v4264_v48   ;;  %v2811_v36 = vrot.slane %v1780_v45, %v6113_v47  ;;  %v4314_v19 = vcombine.low %v2783_v33, %v2787_v21  ;;  %v4315_v41 = vcombine.low %v2791_v30, %v2795_v46 }
 0x323   : > { %v4305_v39 = vrot.slane %v4297_v57, %v6125_v50  ;;  %v4316_v37 = vcombine.low %v2799_v23, %v2803_v38  ;;  %v2815_v58 = vrot.slane %v1787_v10, %v6092_v52  ;;  %v2819_v31 = vrot.slane %v1787_v10, %v6095_v1 }
 0x324   : > { %v4312_v49 = vrot.slane %v4298_v63, %v6125_v50  ;;  %v4317_v34 = vcombine.low %v2807_v13, %v2811_v36  ;;  %v4324_v28 = vrot.slane %v4314_v19, %v6125_v50  ;;  %v4331_v15 = vrot.slane %v4315_v41, %v6125_v50  ;;  %v7035_v5 = vpop.permute.xlu1 %4419  ;;  %v4465_v4 = vpop.permute.xlu0 %4464 }
 0x325   : > { %v4338_v18 = vrot.slane %v4316_v37, %v6125_v50  ;;  %v2823_v9 = vrot.slane %v1787_v10, %v6098_v55  ;;  %v2827_v25 = vrot.slane %v1787_v10, %v6101_v11  ;;  %v2831_v45 = vrot.slane %v1787_v10, %v6104_v54 }
 0x326   : > { %v4313_v43 = vcombine.low %v4305_v39, %v4312_v49  ;;  %v4345_v0 = vrot.slane %v4317_v34, %v6125_v50  ;;  %v4346_v20 = vcombine.low %v4324_v28, %v4331_v15  ;;  %v2835_v52 = vrot.slane %v1787_v10, %v6107_v60 }
 0x327   : > { %v2839_v24 = vrot.slane %v1787_v10, %v6110_v6  ;;  %v2843_v56 = vrot.slane %v1787_v10, %v6113_v47  ;;  %v4363_v12 = vcombine.low %v2815_v58, %v2819_v31  ;;  %v4364_v14 = vcombine.low %v2823_v9, %v2827_v25 }
 0x328   : > { %4500 = vperm.xlu0 %5278, %v4313_v43   ;;  %v4347_v1 = vcombine.low %v4338_v18, %v4345_v0  ;;  %v4354_v26 = vrot.slane %v4346_v20, %v6125_v50  ;;  %v4365_v55 = vcombine.low %v2831_v45, %v2835_v52  ;;  %v7037_v40 = vpop.permute.xlu1 %4428  ;;  %v4512_v38 = vadd.s32 4294967288, %v5748_v2 }
 0x329   : > { %v4366_v42 = vcombine.low %v2839_v24, %v2843_v56  ;;  %v4373_v11 = vrot.slane %v4363_v12, %v6125_v50  ;;  %v4380_v54 = vrot.slane %v4364_v14, %v6125_v50  ;;  %v4526_v13 = vadd.s32 4294967272, %v5748_v2 }
 0x32a   : > { %v4361_v17 = vrot.slane %v4347_v1, %v6125_v50  ;;  %v4387_v22 = vrot.slane %v4365_v55, %v6125_v50  ;;  %v4519_v39 = vadd.s32 4294967280, %v5748_v2  ;;  %v4540_v19 = vadd.s32 4294967256, %v5748_v2 }
 0x32b   : > { %v4394_v60 = vrot.slane %v4366_v42, %v6125_v50  ;;  %v4395_v16 = vcombine.low %v4373_v11, %v4380_v54  ;;  %v4533_v41 = vadd.s32 4294967264, %v5748_v2  ;;  %v4554_v49 = vadd.s32 4294967240, %v5748_v2 }
 0x32c   : > { %v4362_v6 = vcombine.low %v4354_v26, %v4361_v17  ;;  %v7039_v8 = vpop.permute.xlu1 %4425  ;;  %v4568_v37 = vadd.s32 4294967224, %v5748_v2  ;;  %v4547_v58 = vadd.s32 4294967248, %v5748_v2  ;;  %v4515_v34 = vsub.s32 %v4512_v38, %v6083_v62 }
 0x32d   : > { %v4396_v47 = vcombine.low %v4387_v22, %v4394_v60  ;;  %v4403_v29 = vrot.slane %v4395_v16, %v6125_v50  ;;  %v4510_v28 = vsub.s32 %v5748_v2, %v6083_v62  ;;  %v4529_v15 = vsub.s32 %v4526_v13, %v6083_v62 }
 0x32e   : > { %4503 = vperm.xlu0 %5278, %v4362_v6   ;;  %v4522_v31 = vsub.s32 %v4519_v39, %v6083_v62  ;;  %v4543_v18 = vsub.s32 %v4540_v19, %v6083_v62  ;;  %v4536_v9 = vsub.s32 %v4533_v41, %v6083_v62  ;;  %v7087_v0 = vsub.s32 %v4554_v49, %v6083_v62 }
 0x32f   : > { %v4410_v53 = vrot.slane %v4396_v47, %v6125_v50  ;;  %v4561_v20 = vadd.s32 4294967232, %v5748_v2  ;;  %v7091_v45 = vsub.s32 %v4568_v37, %v6083_v62  ;;  %v4550_v52 = vsub.s32 %v4547_v58, %v6083_v62 }
 0x330   : > { %v7041_v61 = vpop.permute.xlu1 %4434  ;;  %v4624_v24 = vrot.slane %v4465_v4, %v4515_v34  ;;  %v4530_v1 = vrot.slane %v7033_v7, %v4529_v15  ;;  %v4523_v26 = vrot.slane %v7035_v5, %v4522_v31  ;;  %vm4517_vm11 = vcmask 130112  }
 0x331   : > { %v4411_v59 = vcombine.low %v4403_v29, %v4410_v53  ;;  %v7053_v10 = vpop.permute.xlu0 %4470  ;;  %v4544_v55 = vrot.slane %v7037_v40, %v4543_v18  ;;  %vm4524_vm13 = vcmask 195712   ;;  %v4537_v11 = vrot.slane %v7039_v8, %v4536_v9 }
 0x332   : > { %v4558_v54 = vrot.slane %v7041_v61, %v7087_v0  ;;  %v4564_v22 = vsub.s32 %v4561_v20, %v6083_v62  ;;  %v4575_v60 = vadd.s32 4294967216, %v5748_v2  ;;  %v4572_v6 = vrot.slane %v7047_v44, %v7091_v45 }
 0x333   : > { %4506 = vperm.xlu0 %5278, %v4411_v59   ;;  %vm4531_vm14 = vcmask 261312   ;;  %v4582_v40 = vadd.s32 4294967208, %v5748_v2  ;;  %v4634_v8 = vrot.slane %v7053_v10, %v4529_v15  ;;  %vm4538_vm15 = vcmask 326912  }
 0x334   : > { %v7043_v51 = vpop.permute.xlu1 %4431  ;;  %v4578_v44 = vsub.s32 %v4575_v60, %v6083_v62  ;;  %vm4545_vm0 = vcmask 392512   ;;  %vm4552_vm1 = vcmask 458112   ;;  %vm4559_vm2 = vcmask 523712  }
 0x335   : > { %v4551_v16 = vrot.slane %v7043_v51, %v4550_v52  ;;  %v4589_v39 = vadd.s32 4294967200, %v5748_v2  ;;  %v4585_v19 = vsub.s32 %v4582_v40, %v6083_v62  ;;  %vm4566_vm3 = vcmask 589312  }
 0x336   : > { %vm4573_vm4 = vcmask 654912   ;;  %vm4580_vm5 = vcmask 720512   ;;  %vm4587_vm6 = vcmask 786112   ;;  %vm4594_vm7 = vcmask 851712  }
 0x337   : > { %vm4601_vm8 = vcmask 917312   ;;  %vm4608_vm9 = vcmask 982912   ;;  %vm4615_vm10 = vcmask 1048512   ;;  %vm4714_vm12 = vcmp.lt.s32.totalorder %v214_v3, 256 }
 0x338   : > { %v7045_v33 = vpop.permute.xlu1 %4437 }
 0x339   : > { %v4565_v4 = vrot.slane %v7045_v33, %v4564_v22 }
 0x33c   : > { %v7049_v35 = vpop.permute.xlu1 %4446 }
 0x33d   : > { %v7055_v30 = vpop.permute.xlu0 %4476 }
 0x33e   : > { %v4644_v33 = vrot.slane %v7055_v30, %v4543_v18 }
 0x340   : > { %v7051_v21 = vpop.permute.xlu1 %4443 }
 0x341   : > { %v4579_v49 = vrot.slane %v7051_v21, %v4578_v44  ;;  %v4586_v21 = vrot.slane %v7049_v35, %v4585_v19 }
 0x344   : > { %v4462_v32 = vpop.permute.xlu1 %4461 }
 0x345   : > { %v4620_v56 = vrot.slane %v4462_v32, %v4510_v28 }
 0x347   : > { %v4625_v47 = vsel %vm4517_vm11, %v4624_v24, %v4620_v56 }
 0x348   : > { %v4468_v27 = vpop.permute.xlu1 %4467 }
 0x349   : > { %v4629_v12 = vrot.slane %v4468_v27, %v4522_v31  ;;  %v4592_v31 = vsub.s32 %v4589_v39, %v6083_v62 }
 0x34b   : > { %v7057_v48 = vpop.permute.xlu0 %4482  ;;  %v4630_v53 = vsel %vm4524_vm13, %v4629_v12, %v4625_v47  ;;  %v4610_v12 = vadd.s32 4294967176, %v5748_v2 }
 0x34c   : > { %v7059_v57 = vpop.permute.xlu1 %4473  ;;  %v4635_v32 = vsel %vm4531_vm14, %v4634_v8, %v4630_v53 }
 0x34d   : > { %v4639_v59 = vrot.slane %v7059_v57, %v4536_v9  ;;  %v4654_v9 = vrot.slane %v7057_v48, %v7087_v0 }
 0x34f   : > { %v4640_v38 = vsel %vm4538_vm15, %v4639_v59, %v4635_v32 }
 0x350   : > { %v7063_v23 = vpop.permute.xlu1 %4479 }
 0x351   : > { %v4649_v13 = vrot.slane %v7063_v23, %v4550_v52  ;;  %v4596_v23 = vadd.s32 4294967192, %v5748_v2 }
 0x353   : > { %v4599_v24 = vsub.s32 %v4596_v23, %v6083_v62 }
 0x35d   : > { %v7061_v46 = vpop.permute.xlu0 %4488 }
 0x35e   : > { %v4664_v48 = vrot.slane %v7061_v46, %v7091_v45 }
 0x366   : > { %v7070_v36 = vpop.permute.xlu1 %4485 }
 0x367   : > { %v4659_v30 = vrot.slane %v7070_v36, %v4564_v22 }
 0x36d   : > { %v4417_v25 = vpop.permute.xlu1 %4416 }
 0x36e   : > { %v4516_v42 = vrot.slane %v4417_v25, %v4515_v34  ;;  %v4645_v34 = vsel %vm4545_vm0, %v4644_v33, %v4640_v38  ;;  %v4603_v25 = vadd.s32 4294967184, %v5748_v2 }
 0x36f   : > { %v4650_v15 = vsel %vm4552_vm1, %v4649_v13, %v4645_v34 }
 0x370   : > { %v4655_v52 = vsel %vm4559_vm2, %v4654_v9, %v4650_v15  ;;  %v4606_v0 = vsub.s32 %v4603_v25, %v6083_v62 }
 0x371   : > { %v4660_v36 = vsel %vm4566_vm3, %v4659_v30, %v4655_v52 }
 0x374   : > { %v7065_v63 = vpop.permute.xlu0 %4494 }
 0x375   : > { %v4674_v2 = vrot.slane %v7065_v63, %v4585_v19 }
 0x37a   : > { %v4450_v7 = vpop.permute.xlu1 %4449 }
 0x381   : > { %v7082_v43 = vpop.permute.xlu0 %4491 }
 0x387   : > { %v4453_v37 = vpop.permute.xlu1 %4452 }
 0x38d   : > { %v4456_v35 = vpop.permute.xlu1 %4455 }
 0x38e   : > { %v4607_v22 = vrot.slane %v4456_v35, %v4606_v0 }
 0x393   : > { %v4459_v60 = vpop.permute.xlu1 %4458 }
 0x39a   : > { %v4414_v14 = vpop.permute.xlu0 %4413 }
 0x39b   : > { %v4511_v17 = vrot.slane %v4414_v14, %v4510_v28 }
 0x39d   : > { %v4518_v29 = vsel %vm4517_vm11, %v4516_v42, %v4511_v17  ;;  %v4665_v42 = vsel %vm4573_vm4, %v4664_v48, %v4660_v36 }
 0x39e   : > { %v4525_v5 = vsel %vm4524_vm13, %v4523_v26, %v4518_v29  ;;  %v4669_v26 = vrot.slane %v7082_v43, %v4578_v44 }
 0x39f   : > { %v4532_v61 = vsel %vm4531_vm14, %v4530_v1, %v4525_v5  ;;  %v4593_v1 = vrot.slane %v4450_v7, %v4592_v31 }
 0x3a0   : > { %v4539_v51 = vsel %vm4538_vm15, %v4537_v11, %v4532_v61  ;;  %v4670_v11 = vsel %vm4580_vm5, %v4669_v26, %v4665_v42 }
 0x3a1   : > { %v4546_v27 = vsel %vm4545_vm0, %v4544_v55, %v4539_v51  ;;  %v4498_v57 = vpop.permute.xlu0 %4497  ;;  %v4600_v55 = vrot.slane %v4453_v37, %v4599_v24 }
 0x3a2   : > { %v4553_v10 = vsel %vm4552_vm1, %v4551_v16, %v4546_v27  ;;  %v4679_v43 = vrot.slane %v4498_v57, %v4592_v31  ;;  %v4675_v16 = vsel %vm4587_vm6, %v4674_v2, %v4670_v11 }
 0x3a3   : > { %v4560_v41 = vsel %vm4559_vm2, %v4558_v54, %v4553_v10  ;;  %v4613_v54 = vsub.s32 %v4610_v12, %v6083_v62 }
 0x3a4   : > { %v4567_v58 = vsel %vm4566_vm3, %v4565_v4, %v4560_v41  ;;  %v4680_v47 = vsel %vm4594_vm7, %v4679_v43, %v4675_v16 }
 0x3a5   : > { %v4574_v28 = vsel %vm4573_vm4, %v4572_v6, %v4567_v58  ;;  %v4614_v53 = vrot.slane %v4459_v60, %v4613_v54 }
 0x3a6   : > { %v4581_v18 = vsel %vm4580_vm5, %v4579_v49, %v4574_v28 }
 0x3a7   : > { %v4501_v20 = vpop.permute.xlu0 %4500  ;;  %v4588_v56 = vsel %vm4587_vm6, %v4586_v21, %v4581_v18 }
 0x3a8   : > { %v4595_v14 = vsel %vm4594_vm7, %v4593_v1, %v4588_v56  ;;  %v4684_v45 = vrot.slane %v4501_v20, %v4599_v24 }
 0x3a9   : > { %v4602_v46 = vsel %vm4601_vm8, %v4600_v55, %v4595_v14 }
 0x3aa   : > { %v4609_v29 = vsel %vm4608_vm9, %v4607_v22, %v4602_v46  ;;  %v4685_v59 = vsel %vm4601_vm8, %v4684_v45, %v4680_v47 }
 0x3ab   : > { %v4616_v5 = vsel %vm4615_vm10, %v4614_v53, %v4609_v29 }
 0x3ad   : > { %v4504_v17 = vpop.permute.xlu0 %4503 }
 0x3ae   : > { %v4689_v6 = vrot.slane %v4504_v17, %v4606_v0 }
 0x3b0   : > { %v4690_v7 = vsel %vm4608_vm9, %v4689_v6, %v4685_v59 }
 0x3b2   : > { %v4507_v62 = vpop.permute.xlu0 %4506 }
 0x3b3   : > { %v4694_v63 = vrot.slane %v4507_v62, %v4613_v54 }
 0x3b5   : > { %v4695_v40 = vsel %vm4615_vm10, %v4694_v63, %v4690_v7 }
 0x3b6   : > { %v4696_v8 = vcombine.low %v4616_v5, %v4695_v40 }
 0x3b8   : > { %v4703_v61 = vrot.slane %v4696_v8, %v6125_v50 }
 0x3ba   : > { %v4710_v4 = vrot.slane %v4703_v61, %v6125_v50 }
 0x3bc   : > { %4716 = vst.msk [vmem:[%s164_s7] sm:$0x3] %vm4714_vm12, %v4710_v4 }
 0x3bd   : > { %5356 = shalt.err (!%p5353_p3)
}
 0x3be   : > { %s5357_s24 = scalar_lea.hbm %s7156_s11, 32  ;;  %s5361_s28 = scalar_lea.hbm %s7201_s3, 64 }
 0x3bf   : > { %p5358_p4 = scmp.ne.s32.totalorder %s7156_s11, %s5357_s24  ;;  %p5362_p9 = scmp.lt.u32.totalorder %s7156_s11, %s7201_s3 }
 0x3c0   : > { %p5363_p10 = scmp.lt.u32.totalorder %s5361_s28, %s5357_s24  ;;  %p5365_p12 = scmp.lt.u32.totalorder %s5357_s24, %s7156_s11 }
 0x3c1   : > { %p5359_p7 = pnand %p5358_p4, %p5468_p5 }
 0x3c2   : > { %p5364_p11 = por %p5363_p10, %p5362_p9 }
 0x3c3   : > { %p5360_p8 = pneg %p5359_p7 }
 0x3c4   : > { %p5366_p13 = por %p5365_p12, %p5364_p11 }
 0x3c6   : > { %p5367_p0 = pnand %p5366_p13, %p5360_p8 }
 0x3c8   : > { %5370 = shalt.err (!%p5367_p0)
}
 0x3c9   : > { %5214 = dma.vmem_to_hbm [thread:$0]  (%p5468_p5), %s7158_s8, 32, %s7156_s11, %s4718_s16  }
 0x3ca PF: > { %p5220_p1 = scmp.ge.s32.totalorder %s5405_s15, 2  ;;  %s4744_s5 = sand.u32 1, %s5393_s12  }
 0x3cb   : > { %s4745_s29 = scalar_lea.sflag [#allocation3], %s4744_s5 }
 0x3cc   : > { %p5217_p2 = pnand %p5220_p1, %p5472_p6 }
 0x3ce   : > { %5388 = dma.done.wait (!%p5217_p2), %s4745_s29, 32  }
 0x3cf   : > { %5390 = vsyncadd (!%p5217_p2), %s4745_s29, 4294967264  ;;  %p13_p3 = scmp.ge.s32.totalorder %s5456_s18, 4   ;;  %s7204_s12 = smov %s5397_s13 }
 0x3d0   : > { %s7205_s13 = smov %s5401_s14  ;;  %s7206_s14 = smov %s5466_s21 }
 0x3d1   : > { %s7207_s15 = smov %s5456_s18  ;;  %15 = sbr.rel (!%p13_p3) target bundleno = 3 (0x3), region = 67 }
 0x3d8   :  { %4750 = vsyncpa [#allocation3], 1 }
 0x3d9   :  { %4752 = vsyncpa [#allocation3 + $0x1], 1 }

</bundles_post_ra>
